<compile_context>
chip_gen: v7x
topology: tpu7x:2x2x1
jax: 0.10.0
libtpu: 0.0.40
codegen_flags: <defaults>
</compile_context>

<pallas_src>
import functools

import jax
import jax.numpy as jnp
from jax import lax
from jax.experimental import pallas as pl
from jax.experimental.pallas import tpu as pltpu


def _encoder_layer_kernel(*refs, h, d_k, d_v, eps, has_mask, has_aw,
                          compute_dtype, approx_recip):
    out_ref = refs[-5]
    kc_ref, vc_ref, qsc_ref, mh_ref = refs[-4:]
    in_refs = refs[:-5]

    i = 0
    q_ref = in_refs[i]; i += 1
    k_ref = in_refs[i]; i += 1
    v_ref = in_refs[i]; i += 1
    if has_mask:
        bias_ref = in_refs[i]; i += 1
    if has_aw:
        aw_ref = in_refs[i]; i += 1
    (wq_ref, bq_ref, wk_ref, bk_ref, wv_ref, bv_ref, wo3_ref, bo_ref,
     ln1g_ref, ln1b_ref, w1_ref, b1_ref, w2_ref, b2_ref,
     ln2g_ref, ln2b_ref) = in_refs[i:]

    cdt = compute_dtype
    f32 = jnp.float32

    # ---- once per batch element: project K/V for all heads with one wide ----
    # ---- matmul each, then cache per head; reused by every query tile.   ----
    @pl.when(pl.program_id(1) == 0)
    def _project_kv():
        kp = (jnp.dot(k_ref[0], wk_ref[...], preferred_element_type=f32)
              + bk_ref[...]).astype(cdt)                       # (S, h*d_k)
        for hi in range(h):
            kc_ref[hi] = kp[:, hi * d_k:(hi + 1) * d_k]
        vp = (jnp.dot(v_ref[0], wv_ref[...], preferred_element_type=f32)
              + bv_ref[...]).astype(cdt)                       # (S, h*d_v)
        for hi in range(h):
            vc_ref[hi] = vp[:, hi * d_v:(hi + 1) * d_v]

    # ---- fused Q projection for this query tile (scale folded into Wq/bq) ----
    q_in = q_ref[0]                                            # (TQ, D) f32 (incl. pos)
    qp = (jnp.dot(q_in.astype(cdt), wq_ref[...], preferred_element_type=f32)
          + bq_ref[...]).astype(cdt)                           # (TQ, h*d_k)
    for hi in range(h):
        qsc_ref[hi] = qp[:, hi * d_k:(hi + 1) * d_k]

    # ---- hoisted mask bias / attention-weight tiles (once per q step) ----
    if has_aw:
        aw = aw_ref[0].astype(f32)                             # (TQ, S)
    if has_mask:
        bias = bias_ref[0].astype(f32)                         # (TQ, S) additive bias

    mh_ref[...] = jnp.zeros_like(mh_ref)                       # (TQ, D) f32 accumulator
    trans_b = (((1,), (1,)), ((), ()))                         # q @ k^T, no .T

    def head_body(hi, carry):
        qh = qsc_ref[hi]                                       # (TQ, d_k) cdt
        kh = kc_ref[hi]                                        # (S,  d_k) cdt
        vh = vc_ref[hi]                                        # (S,  d_v) cdt
        s = lax.dot_general(qh, kh, trans_b,
                            preferred_element_type=f32)        # (TQ, S) f32 (pre-scaled)
        if has_aw:
            s = s * aw
        if has_mask:
            s = s + bias
        m = jnp.max(s, axis=-1, keepdims=True)
        e = jnp.exp(s - m)
        denom = jnp.sum(e, axis=-1, keepdims=True)
        p = e * pl.reciprocal(denom, approx=approx_recip)
        ctx = jnp.dot(p.astype(cdt), vh, preferred_element_type=f32)   # (TQ, d_v)
        # per-head output projection, accumulated in f32 (no concat, no lane writes)
        mh_ref[...] += jnp.dot(ctx.astype(cdt), wo3_ref[hi],
                               preferred_element_type=f32)             # (TQ, D)
        return carry

    lax.fori_loop(0, h, head_body, 0)

    # ---- residual + LayerNorm (post-norm, identity_map_reordering=False) ----
    mh = mh_ref[...] + bo_ref[...]
    x = q_in + mh
    mu = jnp.mean(x, axis=-1, keepdims=True)
    var = jnp.mean((x - mu) ** 2, axis=-1, keepdims=True)
    x = (x - mu) * lax.rsqrt(var + eps) * ln1g_ref[...] + ln1b_ref[...]

    # ---- position-wise feed-forward + residual + LayerNorm ----
    hid = jnp.maximum(
        jnp.dot(x.astype(cdt), w1_ref[...], preferred_element_type=f32)
        + b1_ref[...], 0.0)
    ff = jnp.dot(hid.astype(cdt), w2_ref[...], preferred_element_type=f32) + b2_ref[...]

    y = x + ff
    mu2 = jnp.mean(y, axis=-1, keepdims=True)
    var2 = jnp.mean((y - mu2) ** 2, axis=-1, keepdims=True)
    y = (y - mu2) * lax.rsqrt(var2 + eps) * ln2g_ref[...] + ln2b_ref[...]

    out_ref[0] = y.astype(out_ref.dtype)


def _vmem_capacity_bytes():
    try:
        return int(pltpu.get_tpu_info().vmem_capacity_bytes)
    except Exception:
        return 64 << 20           # conservative fallback (v7x per-TC VMEM)


def _pick_q_tile(S, est_fn, budget, q_tile=None):
    if q_tile is not None:
        assert S % q_tile == 0 and (q_tile % 8 == 0 or q_tile == S)
        return q_tile
    for cand in (512, 256, 128):  # prefer large tiles (per-step overhead amortization)
        if S % cand == 0 and est_fn(cand) <= budget:
            return cand
    for cand in (128, 64, 32, 16, 8):
        if S % cand == 0:
            return cand
    return S


def encoder_layer_cap(queries, keys, values, params, attention_mask=None,
                      attention_weights=None, pos=None, *, h, d_k, d_v,
                      eps=1e-5, compute_dtype=jnp.bfloat16, q_tile=None):
    """Pallas implementation of EncoderLayer_Cap.forward (eval mode).

    queries/keys/values: (B, S, D) float32
    attention_mask:      optional (B, S, S), (1, S, S) or (B, 1, S, S); nonzero => masked out
    attention_weights:   optional (B, S, S) or (1, S, S) multiplicative weights
    pos:                 optional (B, S, D) positional encoding
    """
    queries = queries.astype(jnp.float32)
    keys = keys.astype(jnp.float32)
    values = values.astype(jnp.float32)
    B, S, D = queries.shape
    d_ff = params["w1"].shape[1]
    cdt = jnp.dtype(compute_dtype)
    cbytes = cdt.itemsize
    approx_recip = bool(cdt != jnp.dtype(jnp.float32))

    # ---- positional add done once in the wrapper (residual path includes pos) ----
    if pos is not None:
        pos32 = pos.astype(jnp.float32)
        queries = queries + pos32
        keys = keys + pos32

    keys_c = keys.astype(cdt)        # biggest per-step blocks -> compute dtype
    values_c = values.astype(cdt)

    has_mask = attention_mask is not None
    has_aw = attention_weights is not None

    if has_mask:
        mask = attention_mask
        if mask.ndim == 4:
            mask = mask[:, 0]
        mb = mask.shape[0] if mask.shape[0] in (1, B) else B
        mask = jnp.broadcast_to(mask, (mb, S, S))
        bias = jnp.where(mask.astype(jnp.bool_),
                         jnp.float32(-1e30), jnp.float32(0.0)).astype(cdt)
    if has_aw:
        aw = attention_weights
        if aw.ndim == 4:
            aw = aw[:, 0]
        ab = aw.shape[0] if aw.shape[0] in (1, B) else B
        aw = jnp.broadcast_to(aw, (ab, S, S)).astype(cdt)

    # ---- weights: fused wide projections; 1/sqrt(d_k) folded into Wq/bq;
    # ---- Wo stored per head (h, d_v, D) for leading-dim indexed application.
    scale = 1.0 / float(d_k) ** 0.5
    wq = (params["wq"].astype(jnp.float32) * scale).astype(cdt)       # (D, h*d_k)
    bq = (params["bq"].astype(jnp.float32) * scale).reshape(1, h * d_k)
    wk = params["wk"].astype(cdt)                                     # (D, h*d_k)
    bk = params["bk"].astype(jnp.float32).reshape(1, h * d_k)
    wv = params["wv"].astype(cdt)                                     # (D, h*d_v)
    bv = params["bv"].astype(jnp.float32).reshape(1, h * d_v)
    wo3 = params["wo"].astype(cdt).reshape(h, d_v, D)
    bo = params["bo"].astype(jnp.float32).reshape(1, D)
    w1 = params["w1"].astype(cdt)
    b1 = params["b1"].astype(jnp.float32).reshape(1, d_ff)
    w2 = params["w2"].astype(cdt)
    b2 = params["b2"].astype(jnp.float32).reshape(1, D)
    ln1g = params["ln1_g"].astype(jnp.float32).reshape(1, D)
    ln1b = params["ln1_b"].astype(jnp.float32).reshape(1, D)
    ln2g = params["ln2_g"].astype(jnp.float32).reshape(1, D)
    ln2b = params["ln2_b"].astype(jnp.float32).reshape(1, D)

    weight_arrays = [wq, bq, wk, bk, wv, bv, wo3, bo,
                     ln1g, ln1b, w1, b1, w2, b2, ln2g, ln2b]
    weight_bytes = sum(int(a.size) * a.dtype.itemsize for a in weight_arrays)

    # ---- generation-aware q-tile pick + scoped-VMEM limit ----
    f32b = 4

    def est_fn(tq):
        by = 2 * (tq * D * f32b) * 2                     # q tile + out tile (double-buf)
        by += 2 * (S * D * cbytes) * 2                   # k + v full blocks (double-buf)
        by += 2 * tq * S * cbytes * (int(has_mask) + int(has_aw))
        by += 2 * weight_bytes                           # weights (default double-buf)
        by += h * S * (d_k + d_v) * cbytes               # projected K/V caches
        by += h * tq * d_k * cbytes + tq * D * f32b      # q cache + mh accumulator
        by += 3 * tq * S * f32b                          # s/e/p live set (one head)
        by += tq * S * f32b * (int(has_mask) + int(has_aw))   # hoisted f32 bias/aw
        by += tq * h * d_k * f32b                        # fused q projection temp
        by += max(S * h * max(d_k, d_v) * f32b, tq * d_ff * f32b)
        by += 2 << 20
        return by

    cap = _vmem_capacity_bytes()
    TQ = _pick_q_tile(S, est_fn, int(0.6 * cap), q_tile)
    num_q = S // TQ
    vmem_limit = int(min(max(int(est_fn(TQ) * 1.25), 32 << 20),
                         max(int(0.75 * cap), 24 << 20)))

    q_spec = pl.BlockSpec((1, TQ, D), lambda b, q: (b, q, 0))
    kv_spec = pl.BlockSpec((1, S, D), lambda b, q: (b, 0, 0))

    def full(shape):
        nd = len(shape)
        return pl.BlockSpec(shape, lambda b, q, _nd=nd: (0,) * _nd)

    inputs = [queries, keys_c, values_c]
    in_specs = [q_spec, kv_spec, kv_spec]
    if has_mask:
        inputs.append(bias)
        if bias.shape[0] == 1:
            in_specs.append(pl.BlockSpec((1, TQ, S), lambda b, q: (0, q, 0)))
        else:
            in_specs.append(pl.BlockSpec((1, TQ, S), lambda b, q: (b, q, 0)))
    if has_aw:
        inputs.append(aw)
        if aw.shape[0] == 1:
            in_specs.append(pl.BlockSpec((1, TQ, S), lambda b, q: (0, q, 0)))
        else:
            in_specs.append(pl.BlockSpec((1, TQ, S), lambda b, q: (b, q, 0)))
    inputs += weight_arrays
    in_specs += [full(tuple(a.shape)) for a in weight_arrays]

    kernel = functools.partial(
        _encoder_layer_kernel, h=h, d_k=d_k, d_v=d_v, eps=eps,
        has_mask=has_mask, has_aw=has_aw, compute_dtype=cdt,
        approx_recip=approx_recip)

    return pl.pallas_call(
        kernel,
        out_shape=jax.ShapeDtypeStruct((B, S, D), jnp.float32),
        grid_spec=pltpu.PrefetchScalarGridSpec(
            num_scalar_prefetch=0,
            grid=(B, num_q),
            in_specs=in_specs,
            out_specs=pl.BlockSpec((1, TQ, D), lambda b, q: (b, q, 0)),
            scratch_shapes=[
                pltpu.VMEM((h, S, d_k), cdt),       # projected K, per head
                pltpu.VMEM((h, S, d_v), cdt),       # projected V, per head
                pltpu.VMEM((h, TQ, d_k), cdt),      # projected Q tile, per head
                pltpu.VMEM((TQ, D), jnp.float32),   # multi-head output accumulator
            ],
        ),
        compiler_params=pltpu.CompilerParams(
            # q axis must be "arbitrary": projected K/V caches persist across
            # q steps of one batch element. Batch stays "parallel" (megacore).
            dimension_semantics=("parallel", "arbitrary"),
            vmem_limit_bytes=vmem_limit),
    )(*inputs)


# ---------------------------------------------------------------------------
# Pure-JAX reference (mirrors the PyTorch forward, eval mode) for validation.
# ---------------------------------------------------------------------------
def _reference(queries, keys, values, params, attention_mask=None,
               attention_weights=None, pos=None, *, h, d_k, d_v, eps=1e-5):
    q_in = queries + (pos if pos is not None else 0.0)
    k_in = keys + (pos if pos is not None else 0.0)
    B, S, D = q_in.shape

    def ln(x, g, b):
        mu = jnp.mean(x, axis=-1, keepdims=True)
        var = jnp.mean((x - mu) ** 2, axis=-1, keepdims=True)
        return (x - mu) * jax.lax.rsqrt(var + eps) * g + b

    qp = (q_in @ params["wq"] + params["bq"]).reshape(B, S, h, d_k).transpose(0, 2, 1, 3)
    kp = (k_in @ params["wk"] + params["bk"]).reshape(B, S, h, d_k).transpose(0, 2, 1, 3)
    vp = (values @ params["wv"] + params["bv"]).reshape(B, S, h, d_v).transpose(0, 2, 1, 3)
    att = jnp.einsum("bhqd,bhkd->bhqk", qp, kp) / jnp.sqrt(jnp.float32(d_k))
    if attention_weights is not None:
        att = att * attention_weights[:, None]
    if attention_mask is not None:
        att = jnp.where(attention_mask[:, None] > 0.5, -1e30, att)
    att = jax.nn.softmax(att, axis=-1)
    out = jnp.einsum("bhqk,bhkd->bhqd", att, vp).transpose(0, 2, 1, 3).reshape(B, S, h * d_v)
    out = out @ params["wo"] + params["bo"]
    x = ln(q_in + out, params["ln1_g"], params["ln1_b"])
    ff = jnp.maximum(x @ params["w1"] + params["b1"], 0.0) @ params["w2"] + params["b2"]
    return ln(x + ff, params["ln2_g"], params["ln2_b"])


def _init_params(key, d_model, d_k, d_v, h, d_ff):
    """Deterministic init matching nn.Linear's shapes (W stored as (in, out))."""
    ks = jax.random.split(key, 12)

    def lin(kw, kb, fan_in, fan_out):
        bound = 1.0 / jnp.sqrt(jnp.float32(fan_in))
        w = jax.random.uniform(kw, (fan_in, fan_out), jnp.float32, -bound, bound)
        b = jax.random.uniform(kb, (1, fan_out), jnp.float32, -bound, bound)
        return w, b

    wq, bq = lin(ks[0], ks[1], d_model, h * d_k)
    wk, bk = lin(ks[2], ks[3], d_model, h * d_k)
    wv, bv = lin(ks[4], ks[5], d_model, h * d_v)
    wo, bo = lin(ks[6], ks[7], h * d_v, d_model)
    w1, b1 = lin(ks[8], ks[9], d_model, d_ff)
    w2, b2 = lin(ks[10], ks[11], d_ff, d_model)
    ones = jnp.ones((1, d_model), jnp.float32)
    zeros = jnp.zeros((1, d_model), jnp.float32)
    return dict(wq=wq, bq=bq, wk=wk, bk=bk, wv=wv, bv=bv, wo=wo, bo=bo,
                ln1_g=ones, ln1_b=zeros, w1=w1, b1=b1, w2=w2, b2=b2,
                ln2_g=ones, ln2_b=zeros)


if __name__ == "__main__":
    B, S = 2, 8
    d_model, d_k, d_v, h, d_ff = 32, 8, 8, 4, 64

    key = jax.random.PRNGKey(0)
    kq, kk, kv, kp, ka, kw = jax.random.split(key, 6)
    queries = jax.random.normal(kq, (B, S, d_model), jnp.float32)
    keys_ = jax.random.normal(kk, (B, S, d_model), jnp.float32)
    values = jax.random.normal(kv, (B, S, d_model), jnp.float32)
    pos = jax.random.normal(kp, (B, S, d_model), jnp.float32)

    # causal mask (no fully-masked query rows) + multiplicative attention weights
    causal = (jnp.arange(S)[None, :] > jnp.arange(S)[:, None]).astype(jnp.float32)
    mask = jnp.broadcast_to(causal, (B, S, S))
    aw = jax.random.uniform(ka, (B, S, S), jnp.float32, minval=0.5, maxval=1.5)

    params = _init_params(kw, d_model, d_k, d_v, h, d_ff)

    # --- 1) production config: bf16 matmuls, mask + attention_weights + pos ---
    out_bf16 = encoder_layer_cap(queries, keys_, values, params,
                                 attention_mask=mask, attention_weights=aw,
                                 pos=pos, h=h, d_k=d_k, d_v=d_v,
                                 compute_dtype=jnp.bfloat16)
    out_bf16 = jax.block_until_ready(out_bf16)
    ref_m = _reference(queries, keys_, values, params, attention_mask=mask,
                       attention_weights=aw, pos=pos, h=h, d_k=d_k, d_v=d_v)
    assert out_bf16.shape == (B, S, d_model)
    assert jnp.allclose(out_bf16, ref_m, atol=5e-2, rtol=5e-2), \
        float(jnp.max(jnp.abs(out_bf16 - ref_m)))

    # --- 2) f32 config, no mask / no attention_weights (trace-time specialization) ---
    out_f32 = encoder_layer_cap(queries, keys_, values, params,
                                attention_mask=None, attention_weights=None,
                                pos=pos, h=h, d_k=d_k, d_v=d_v,
                                compute_dtype=jnp.float32)
    out_f32 = jax.block_until_ready(out_f32)
    ref_nm = _reference(queries, keys_, values, params, pos=pos,
                        h=h, d_k=d_k, d_v=d_v)
    assert jnp.allclose(out_f32, ref_nm, atol=1e-2, rtol=1e-2), \
        float(jnp.max(jnp.abs(out_f32 - ref_nm)))

    # --- 3) multi-q-tile grid path (S=16, TQ=8): exercises per-batch K/V cache ---
    S2 = 16
    kq2, kk2, kv2, kp2, ka2 = jax.random.split(jax.random.PRNGKey(1), 5)
    q2 = jax.random.normal(kq2, (B, S2, d_model), jnp.float32)
    k2 = jax.random.normal(kk2, (B, S2, d_model), jnp.float32)
    v2 = jax.random.normal(kv2, (B, S2, d_model), jnp.float32)
    p2 = jax.random.normal(kp2, (B, S2, d_model), jnp.float32)
    causal2 = (jnp.arange(S2)[None, :] > jnp.arange(S2)[:, None]).astype(jnp.float32)
    mask2 = jnp.broadcast_to(causal2, (B, S2, S2))
    aw2 = jax.random.uniform(ka2, (B, S2, S2), jnp.float32, minval=0.5, maxval=1.5)
    out_t = encoder_layer_cap(q2, k2, v2, params, attention_mask=mask2,
                              attention_weights=aw2, pos=p2, h=h, d_k=d_k,
                              d_v=d_v, compute_dtype=jnp.float32, q_tile=8)
    out_t = jax.block_until_ready(out_t)
    ref_t = _reference(q2, k2, v2, params, attention_mask=mask2,
                       attention_weights=aw2, pos=p2, h=h, d_k=d_k, d_v=d_v)
    assert jnp.allclose(out_t, ref_t, atol=1e-2, rtol=1e-2), \
        float(jnp.max(jnp.abs(out_t - ref_t)))

    print("KERNEL_OK")
</pallas_src>

<mosaic_0001>
module attributes {stable_mosaic.version = 11 : i64} {
  func.func @_encoder_layer_kernel(%arg0: i32, %arg1: i32, %arg2: memref<1x8x32xf32, #tpu.memory_space<vmem>>, %arg3: memref<1x8x32xbf16, #tpu.memory_space<vmem>>, %arg4: memref<1x8x32xbf16, #tpu.memory_space<vmem>>, %arg5: memref<1x8x8xbf16, #tpu.memory_space<vmem>>, %arg6: memref<1x8x8xbf16, #tpu.memory_space<vmem>>, %arg7: memref<32x32xbf16, #tpu.memory_space<vmem>>, %arg8: memref<1x32xf32, #tpu.memory_space<vmem>>, %arg9: memref<32x32xbf16, #tpu.memory_space<vmem>>, %arg10: memref<1x32xf32, #tpu.memory_space<vmem>>, %arg11: memref<32x32xbf16, #tpu.memory_space<vmem>>, %arg12: memref<1x32xf32, #tpu.memory_space<vmem>>, %arg13: memref<4x8x32xbf16, #tpu.memory_space<vmem>>, %arg14: memref<1x32xf32, #tpu.memory_space<vmem>>, %arg15: memref<1x32xf32, #tpu.memory_space<vmem>>, %arg16: memref<1x32xf32, #tpu.memory_space<vmem>>, %arg17: memref<32x64xbf16, #tpu.memory_space<vmem>>, %arg18: memref<1x64xf32, #tpu.memory_space<vmem>>, %arg19: memref<64x32xbf16, #tpu.memory_space<vmem>>, %arg20: memref<1x32xf32, #tpu.memory_space<vmem>>, %arg21: memref<1x32xf32, #tpu.memory_space<vmem>>, %arg22: memref<1x32xf32, #tpu.memory_space<vmem>>, %arg23: memref<1x8x32xf32, #tpu.memory_space<vmem>>, %arg24: memref<4x8x8xbf16, #tpu.memory_space<vmem>>, %arg25: memref<4x8x8xbf16, #tpu.memory_space<vmem>>, %arg26: memref<4x8x8xbf16, #tpu.memory_space<vmem>>, %arg27: memref<8x32xf32, #tpu.memory_space<vmem>>) attributes {dimension_semantics = [#tpu.dimension_semantics<parallel>, #tpu.dimension_semantics<arbitrary>], iteration_bounds = array<i64: 2, 1>, scalar_prefetch = 0 : i64, scratch_operands = 4 : i64, tpu.core_type = #tpu.core_type<tc>, window_params = [{transform_indices = @transform_0, window_bounds = array<i64: 1, 8, 32>}, {transform_indices = @transform_1, window_bounds = array<i64: 1, 8, 32>}, {transform_indices = @transform_2, window_bounds = array<i64: 1, 8, 32>}, {transform_indices = @transform_3, window_bounds = array<i64: 1, 8, 8>}, {transform_indices = @transform_4, window_bounds = array<i64: 1, 8, 8>}, {pipeline_mode = #tpu.pipeline_mode<synchronous>, transform_indices = @transform_5, window_bounds = array<i64: 32, 32>}, {pipeline_mode = #tpu.pipeline_mode<synchronous>, transform_indices = @transform_6, window_bounds = array<i64: 1, 32>}, {pipeline_mode = #tpu.pipeline_mode<synchronous>, transform_indices = @transform_7, window_bounds = array<i64: 32, 32>}, {pipeline_mode = #tpu.pipeline_mode<synchronous>, transform_indices = @transform_8, window_bounds = array<i64: 1, 32>}, {pipeline_mode = #tpu.pipeline_mode<synchronous>, transform_indices = @transform_9, window_bounds = array<i64: 32, 32>}, {pipeline_mode = #tpu.pipeline_mode<synchronous>, transform_indices = @transform_10, window_bounds = array<i64: 1, 32>}, {pipeline_mode = #tpu.pipeline_mode<synchronous>, transform_indices = @transform_11, window_bounds = array<i64: 4, 8, 32>}, {pipeline_mode = #tpu.pipeline_mode<synchronous>, transform_indices = @transform_12, window_bounds = array<i64: 1, 32>}, {pipeline_mode = #tpu.pipeline_mode<synchronous>, transform_indices = @transform_13, window_bounds = array<i64: 1, 32>}, {pipeline_mode = #tpu.pipeline_mode<synchronous>, transform_indices = @transform_14, window_bounds = array<i64: 1, 32>}, {pipeline_mode = #tpu.pipeline_mode<synchronous>, transform_indices = @transform_15, window_bounds = array<i64: 32, 64>}, {pipeline_mode = #tpu.pipeline_mode<synchronous>, transform_indices = @transform_16, window_bounds = array<i64: 1, 64>}, {pipeline_mode = #tpu.pipeline_mode<synchronous>, transform_indices = @transform_17, window_bounds = array<i64: 64, 32>}, {pipeline_mode = #tpu.pipeline_mode<synchronous>, transform_indices = @transform_18, window_bounds = array<i64: 1, 32>}, {pipeline_mode = #tpu.pipeline_mode<synchronous>, transform_indices = @transform_19, window_bounds = array<i64: 1, 32>}, {pipeline_mode = #tpu.pipeline_mode<synchronous>, transform_indices = @transform_20, window_bounds = array<i64: 1, 32>}, {transform_indices = @transform_21, window_bounds = array<i64: 1, 8, 32>}]} {
    %c0_i32 = arith.constant 0 : i32
    %0 = arith.cmpi eq, %arg1, %c0_i32 : i32
    %1 = arith.extui %0 : i1 to i32
    %c0_i32_0 = arith.constant 0 : i32
    %2 = arith.cmpi ne, %1, %c0_i32_0 : i32
    scf.if %2 {
      %c0_63 = arith.constant 0 : index
      %c0_64 = arith.constant 0 : index
      %c0_65 = arith.constant 0 : index
      %108 = vector.load %arg3[%c0_63, %c0_64, %c0_65] : memref<1x8x32xbf16, #tpu.memory_space<vmem>>, vector<1x8x32xbf16>
      %109 = vector.shape_cast %108 : vector<1x8x32xbf16> to vector<8x32xbf16>
      %c0_66 = arith.constant 0 : index
      %c0_67 = arith.constant 0 : index
      %110 = vector.load %arg9[%c0_66, %c0_67] : memref<32x32xbf16, #tpu.memory_space<vmem>>, vector<32x32xbf16>
      %cst_68 = arith.constant dense<0.000000e+00> : vector<8x32xf32>
      %111 = tpu.matmul %109, %110, %cst_68 {dimension_numbers = #tpu.dot_dimension_numbers<[1], [0], [0], [1], [0, 0, 1, 1], [], []>} : vector<8x32xbf16>, vector<32x32xbf16>, vector<8x32xf32> -> vector<8x32xf32>
      %c0_69 = arith.constant 0 : index
      %c0_70 = arith.constant 0 : index
      %112 = vector.load %arg10[%c0_69, %c0_70] : memref<1x32xf32, #tpu.memory_space<vmem>>, vector<1x32xf32>
      %113 = vector.broadcast %112 : vector<1x32xf32> to vector<8x32xf32>
      %114 = arith.addf %111, %113 : vector<8x32xf32>
      %115 = arith.truncf %114 : vector<8x32xf32> to vector<8x32xbf16>
      %116 = vector.extract_strided_slice %115 {offsets = [0, 0], sizes = [8, 8], strides = [1, 1]} : vector<8x32xbf16> to vector<8x8xbf16>
      %c0_71 = arith.constant 0 : index
      %c0_72 = arith.constant 0 : index
      %c0_73 = arith.constant 0 : index
      %117 = vector.load %arg24[%c0_71, %c0_72, %c0_73] : memref<4x8x8xbf16, #tpu.memory_space<vmem>>, vector<1x8x8xbf16>
      %118 = vector.shape_cast %117 : vector<1x8x8xbf16> to vector<8x8xbf16>
      %119 = vector.shape_cast %116 : vector<8x8xbf16> to vector<1x8x8xbf16>
      tpu.vector_store %arg24[%c0_71, %c0_72, %c0_73], %119 {strides = array<i32>} : memref<4x8x8xbf16, #tpu.memory_space<vmem>>, vector<1x8x8xbf16>,
      %120 = vector.extract_strided_slice %115 {offsets = [0, 8], sizes = [8, 8], strides = [1, 1]} : vector<8x32xbf16> to vector<8x8xbf16>
      %c1_74 = arith.constant 1 : index
      %c0_75 = arith.constant 0 : index
      %c0_76 = arith.constant 0 : index
      %121 = vector.load %arg24[%c1_74, %c0_75, %c0_76] : memref<4x8x8xbf16, #tpu.memory_space<vmem>>, vector<1x8x8xbf16>
      %122 = vector.shape_cast %121 : vector<1x8x8xbf16> to vector<8x8xbf16>
      %123 = vector.shape_cast %120 : vector<8x8xbf16> to vector<1x8x8xbf16>
      tpu.vector_store %arg24[%c1_74, %c0_75, %c0_76], %123 {strides = array<i32>} : memref<4x8x8xbf16, #tpu.memory_space<vmem>>, vector<1x8x8xbf16>,
      %124 = vector.extract_strided_slice %115 {offsets = [0, 16], sizes = [8, 8], strides = [1, 1]} : vector<8x32xbf16> to vector<8x8xbf16>
      %c2_77 = arith.constant 2 : index
      %c0_78 = arith.constant 0 : index
      %c0_79 = arith.constant 0 : index
      %125 = vector.load %arg24[%c2_77, %c0_78, %c0_79] : memref<4x8x8xbf16, #tpu.memory_space<vmem>>, vector<1x8x8xbf16>
      %126 = vector.shape_cast %125 : vector<1x8x8xbf16> to vector<8x8xbf16>
      %127 = vector.shape_cast %124 : vector<8x8xbf16> to vector<1x8x8xbf16>
      tpu.vector_store %arg24[%c2_77, %c0_78, %c0_79], %127 {strides = array<i32>} : memref<4x8x8xbf16, #tpu.memory_space<vmem>>, vector<1x8x8xbf16>,
      %128 = vector.extract_strided_slice %115 {offsets = [0, 24], sizes = [8, 8], strides = [1, 1]} : vector<8x32xbf16> to vector<8x8xbf16>
      %c3_80 = arith.constant 3 : index
      %c0_81 = arith.constant 0 : index
      %c0_82 = arith.constant 0 : index
      %129 = vector.load %arg24[%c3_80, %c0_81, %c0_82] : memref<4x8x8xbf16, #tpu.memory_space<vmem>>, vector<1x8x8xbf16>
      %130 = vector.shape_cast %129 : vector<1x8x8xbf16> to vector<8x8xbf16>
      %131 = vector.shape_cast %128 : vector<8x8xbf16> to vector<1x8x8xbf16>
      tpu.vector_store %arg24[%c3_80, %c0_81, %c0_82], %131 {strides = array<i32>} : memref<4x8x8xbf16, #tpu.memory_space<vmem>>, vector<1x8x8xbf16>,
      %c0_83 = arith.constant 0 : index
      %c0_84 = arith.constant 0 : index
      %c0_85 = arith.constant 0 : index
      %132 = vector.load %arg4[%c0_83, %c0_84, %c0_85] : memref<1x8x32xbf16, #tpu.memory_space<vmem>>, vector<1x8x32xbf16>
      %133 = vector.shape_cast %132 : vector<1x8x32xbf16> to vector<8x32xbf16>
      %c0_86 = arith.constant 0 : index
      %c0_87 = arith.constant 0 : index
      %134 = vector.load %arg11[%c0_86, %c0_87] : memref<32x32xbf16, #tpu.memory_space<vmem>>, vector<32x32xbf16>
      %cst_88 = arith.constant dense<0.000000e+00> : vector<8x32xf32>
      %135 = tpu.matmul %133, %134, %cst_88 {dimension_numbers = #tpu.dot_dimension_numbers<[1], [0], [0], [1], [0, 0, 1, 1], [], []>} : vector<8x32xbf16>, vector<32x32xbf16>, vector<8x32xf32> -> vector<8x32xf32>
      %c0_89 = arith.constant 0 : index
      %c0_90 = arith.constant 0 : index
      %136 = vector.load %arg12[%c0_89, %c0_90] : memref<1x32xf32, #tpu.memory_space<vmem>>, vector<1x32xf32>
      %137 = vector.broadcast %136 : vector<1x32xf32> to vector<8x32xf32>
      %138 = arith.addf %135, %137 : vector<8x32xf32>
      %139 = arith.truncf %138 : vector<8x32xf32> to vector<8x32xbf16>
      %140 = vector.extract_strided_slice %139 {offsets = [0, 0], sizes = [8, 8], strides = [1, 1]} : vector<8x32xbf16> to vector<8x8xbf16>
      %c0_91 = arith.constant 0 : index
      %c0_92 = arith.constant 0 : index
      %c0_93 = arith.constant 0 : index
      %141 = vector.load %arg25[%c0_91, %c0_92, %c0_93] : memref<4x8x8xbf16, #tpu.memory_space<vmem>>, vector<1x8x8xbf16>
      %142 = vector.shape_cast %141 : vector<1x8x8xbf16> to vector<8x8xbf16>
      %143 = vector.shape_cast %140 : vector<8x8xbf16> to vector<1x8x8xbf16>
      tpu.vector_store %arg25[%c0_91, %c0_92, %c0_93], %143 {strides = array<i32>} : memref<4x8x8xbf16, #tpu.memory_space<vmem>>, vector<1x8x8xbf16>,
      %144 = vector.extract_strided_slice %139 {offsets = [0, 8], sizes = [8, 8], strides = [1, 1]} : vector<8x32xbf16> to vector<8x8xbf16>
      %c1_94 = arith.constant 1 : index
      %c0_95 = arith.constant 0 : index
      %c0_96 = arith.constant 0 : index
      %145 = vector.load %arg25[%c1_94, %c0_95, %c0_96] : memref<4x8x8xbf16, #tpu.memory_space<vmem>>, vector<1x8x8xbf16>
      %146 = vector.shape_cast %145 : vector<1x8x8xbf16> to vector<8x8xbf16>
      %147 = vector.shape_cast %144 : vector<8x8xbf16> to vector<1x8x8xbf16>
      tpu.vector_store %arg25[%c1_94, %c0_95, %c0_96], %147 {strides = array<i32>} : memref<4x8x8xbf16, #tpu.memory_space<vmem>>, vector<1x8x8xbf16>,
      %148 = vector.extract_strided_slice %139 {offsets = [0, 16], sizes = [8, 8], strides = [1, 1]} : vector<8x32xbf16> to vector<8x8xbf16>
      %c2_97 = arith.constant 2 : index
      %c0_98 = arith.constant 0 : index
      %c0_99 = arith.constant 0 : index
      %149 = vector.load %arg25[%c2_97, %c0_98, %c0_99] : memref<4x8x8xbf16, #tpu.memory_space<vmem>>, vector<1x8x8xbf16>
      %150 = vector.shape_cast %149 : vector<1x8x8xbf16> to vector<8x8xbf16>
      %151 = vector.shape_cast %148 : vector<8x8xbf16> to vector<1x8x8xbf16>
      tpu.vector_store %arg25[%c2_97, %c0_98, %c0_99], %151 {strides = array<i32>} : memref<4x8x8xbf16, #tpu.memory_space<vmem>>, vector<1x8x8xbf16>,
      %152 = vector.extract_strided_slice %139 {offsets = [0, 24], sizes = [8, 8], strides = [1, 1]} : vector<8x32xbf16> to vector<8x8xbf16>
      %c3_100 = arith.constant 3 : index
      %c0_101 = arith.constant 0 : index
      %c0_102 = arith.constant 0 : index
      %153 = vector.load %arg25[%c3_100, %c0_101, %c0_102] : memref<4x8x8xbf16, #tpu.memory_space<vmem>>, vector<1x8x8xbf16>
      %154 = vector.shape_cast %153 : vector<1x8x8xbf16> to vector<8x8xbf16>
      %155 = vector.shape_cast %152 : vector<8x8xbf16> to vector<1x8x8xbf16>
      tpu.vector_store %arg25[%c3_100, %c0_101, %c0_102], %155 {strides = array<i32>} : memref<4x8x8xbf16, #tpu.memory_space<vmem>>, vector<1x8x8xbf16>,
    } else {
    }
    %c0 = arith.constant 0 : index
    %c0_1 = arith.constant 0 : index
    %c0_2 = arith.constant 0 : index
    %3 = vector.load %arg2[%c0, %c0_1, %c0_2] : memref<1x8x32xf32, #tpu.memory_space<vmem>>, vector<1x8x32xf32>
    %4 = vector.shape_cast %3 : vector<1x8x32xf32> to vector<8x32xf32>
    %5 = arith.truncf %4 : vector<8x32xf32> to vector<8x32xbf16>
    %c0_3 = arith.constant 0 : index
    %c0_4 = arith.constant 0 : index
    %6 = vector.load %arg7[%c0_3, %c0_4] : memref<32x32xbf16, #tpu.memory_space<vmem>>, vector<32x32xbf16>
    %cst = arith.constant dense<0.000000e+00> : vector<8x32xf32>
    %7 = tpu.matmul %5, %6, %cst {dimension_numbers = #tpu.dot_dimension_numbers<[1], [0], [0], [1], [0, 0, 1, 1], [], []>} : vector<8x32xbf16>, vector<32x32xbf16>, vector<8x32xf32> -> vector<8x32xf32>
    %c0_5 = arith.constant 0 : index
    %c0_6 = arith.constant 0 : index
    %8 = vector.load %arg8[%c0_5, %c0_6] : memref<1x32xf32, #tpu.memory_space<vmem>>, vector<1x32xf32>
    %9 = vector.broadcast %8 : vector<1x32xf32> to vector<8x32xf32>
    %10 = arith.addf %7, %9 : vector<8x32xf32>
    %11 = arith.truncf %10 : vector<8x32xf32> to vector<8x32xbf16>
    %12 = vector.extract_strided_slice %11 {offsets = [0, 0], sizes = [8, 8], strides = [1, 1]} : vector<8x32xbf16> to vector<8x8xbf16>
    %c0_7 = arith.constant 0 : index
    %c0_8 = arith.constant 0 : index
    %c0_9 = arith.constant 0 : index
    %13 = vector.load %arg26[%c0_7, %c0_8, %c0_9] : memref<4x8x8xbf16, #tpu.memory_space<vmem>>, vector<1x8x8xbf16>
    %14 = vector.shape_cast %13 : vector<1x8x8xbf16> to vector<8x8xbf16>
    %15 = vector.shape_cast %12 : vector<8x8xbf16> to vector<1x8x8xbf16>
    tpu.vector_store %arg26[%c0_7, %c0_8, %c0_9], %15 {strides = array<i32>} : memref<4x8x8xbf16, #tpu.memory_space<vmem>>, vector<1x8x8xbf16>,
    %16 = vector.extract_strided_slice %11 {offsets = [0, 8], sizes = [8, 8], strides = [1, 1]} : vector<8x32xbf16> to vector<8x8xbf16>
    %c1 = arith.constant 1 : index
    %c0_10 = arith.constant 0 : index
    %c0_11 = arith.constant 0 : index
    %17 = vector.load %arg26[%c1, %c0_10, %c0_11] : memref<4x8x8xbf16, #tpu.memory_space<vmem>>, vector<1x8x8xbf16>
    %18 = vector.shape_cast %17 : vector<1x8x8xbf16> to vector<8x8xbf16>
    %19 = vector.shape_cast %16 : vector<8x8xbf16> to vector<1x8x8xbf16>
    tpu.vector_store %arg26[%c1, %c0_10, %c0_11], %19 {strides = array<i32>} : memref<4x8x8xbf16, #tpu.memory_space<vmem>>, vector<1x8x8xbf16>,
    %20 = vector.extract_strided_slice %11 {offsets = [0, 16], sizes = [8, 8], strides = [1, 1]} : vector<8x32xbf16> to vector<8x8xbf16>
    %c2 = arith.constant 2 : index
    %c0_12 = arith.constant 0 : index
    %c0_13 = arith.constant 0 : index
    %21 = vector.load %arg26[%c2, %c0_12, %c0_13] : memref<4x8x8xbf16, #tpu.memory_space<vmem>>, vector<1x8x8xbf16>
    %22 = vector.shape_cast %21 : vector<1x8x8xbf16> to vector<8x8xbf16>
    %23 = vector.shape_cast %20 : vector<8x8xbf16> to vector<1x8x8xbf16>
    tpu.vector_store %arg26[%c2, %c0_12, %c0_13], %23 {strides = array<i32>} : memref<4x8x8xbf16, #tpu.memory_space<vmem>>, vector<1x8x8xbf16>,
    %24 = vector.extract_strided_slice %11 {offsets = [0, 24], sizes = [8, 8], strides = [1, 1]} : vector<8x32xbf16> to vector<8x8xbf16>
    %c3 = arith.constant 3 : index
    %c0_14 = arith.constant 0 : index
    %c0_15 = arith.constant 0 : index
    %25 = vector.load %arg26[%c3, %c0_14, %c0_15] : memref<4x8x8xbf16, #tpu.memory_space<vmem>>, vector<1x8x8xbf16>
    %26 = vector.shape_cast %25 : vector<1x8x8xbf16> to vector<8x8xbf16>
    %27 = vector.shape_cast %24 : vector<8x8xbf16> to vector<1x8x8xbf16>
    tpu.vector_store %arg26[%c3, %c0_14, %c0_15], %27 {strides = array<i32>} : memref<4x8x8xbf16, #tpu.memory_space<vmem>>, vector<1x8x8xbf16>,
    %c0_16 = arith.constant 0 : index
    %c0_17 = arith.constant 0 : index
    %c0_18 = arith.constant 0 : index
    %28 = vector.load %arg6[%c0_16, %c0_17, %c0_18] : memref<1x8x8xbf16, #tpu.memory_space<vmem>>, vector<1x8x8xbf16>
    %29 = vector.shape_cast %28 : vector<1x8x8xbf16> to vector<8x8xbf16>
    %30 = arith.extf %29 : vector<8x8xbf16> to vector<8x8xf32>
    %c0_19 = arith.constant 0 : index
    %c0_20 = arith.constant 0 : index
    %c0_21 = arith.constant 0 : index
    %31 = vector.load %arg5[%c0_19, %c0_20, %c0_21] : memref<1x8x8xbf16, #tpu.memory_space<vmem>>, vector<1x8x8xbf16>
    %32 = vector.shape_cast %31 : vector<1x8x8xbf16> to vector<8x8xbf16>
    %33 = arith.extf %32 : vector<8x8xbf16> to vector<8x8xf32>
    %cst_22 = arith.constant 0.000000e+00 : f32
    %34 = vector.broadcast %cst_22 : f32 to vector<8x32xf32>
    %c0_23 = arith.constant 0 : index
    %c0_24 = arith.constant 0 : index
    %35 = vector.load %arg27[%c0_23, %c0_24] : memref<8x32xf32, #tpu.memory_space<vmem>>, vector<8x32xf32>
    tpu.vector_store %arg27[%c0_23, %c0_24], %34 {strides = array<i32>} : memref<8x32xf32, #tpu.memory_space<vmem>>, vector<8x32xf32>,
    %c0_i32_25 = arith.constant 0 : i32
    %c4_i32 = arith.constant 4 : i32
    %36 = arith.addi %c0_i32_25, %c4_i32 : i32
    %c1_i32 = arith.constant 1 : i32
    scf.for %arg28 = %c0_i32_25 to %36 step %c1_i32  : i32 {
      %108 = arith.index_cast %arg28 : i32 to index
      %c0_63 = arith.constant 0 : index
      %c0_64 = arith.constant 0 : index
      %109 = vector.load %arg26[%108, %c0_63, %c0_64] : memref<4x8x8xbf16, #tpu.memory_space<vmem>>, vector<1x8x8xbf16>
      %110 = vector.shape_cast %109 : vector<1x8x8xbf16> to vector<8x8xbf16>
      %111 = arith.index_cast %arg28 : i32 to index
      %c0_65 = arith.constant 0 : index
      %c0_66 = arith.constant 0 : index
      %112 = vector.load %arg24[%111, %c0_65, %c0_66] : memref<4x8x8xbf16, #tpu.memory_space<vmem>>, vector<1x8x8xbf16>
      %113 = vector.shape_cast %112 : vector<1x8x8xbf16> to vector<8x8xbf16>
      %114 = arith.index_cast %arg28 : i32 to index
      %c0_67 = arith.constant 0 : index
      %c0_68 = arith.constant 0 : index
      %115 = vector.load %arg25[%114, %c0_67, %c0_68] : memref<4x8x8xbf16, #tpu.memory_space<vmem>>, vector<1x8x8xbf16>
      %116 = vector.shape_cast %115 : vector<1x8x8xbf16> to vector<8x8xbf16>
      %cst_69 = arith.constant dense<0.000000e+00> : vector<8x8xf32>
      %117 = tpu.matmul %110, %113, %cst_69 {dimension_numbers = #tpu.dot_dimension_numbers<[1], [1], [0], [0], [0, 0, 1, 0], [], []>} : vector<8x8xbf16>, vector<8x8xbf16>, vector<8x8xf32> -> vector<8x8xf32>
      %118 = arith.mulf %117, %30 : vector<8x8xf32>
      %119 = arith.addf %118, %33 : vector<8x8xf32>
      %cst_70 = arith.constant dense<0xFF800000> : vector<8xf32>
      %120 = vector.multi_reduction <maximumf>, %119, %cst_70 [1] : vector<8x8xf32> to vector<8xf32>
      %121 = vector.shape_cast %120 : vector<8xf32> to vector<8x1xf32>
      %122 = vector.broadcast %121 : vector<8x1xf32> to vector<8x8xf32>
      %123 = arith.subf %119, %122 : vector<8x8xf32>
      %124 = math.exp %123 : vector<8x8xf32>
      %cst_71 = arith.constant dense<0.000000e+00> : vector<8xf32>
      %125 = vector.multi_reduction <add>, %124, %cst_71 [1] : vector<8x8xf32> to vector<8xf32>
      %126 = vector.shape_cast %125 : vector<8xf32> to vector<8x1xf32>
      %127 = tpu.reciprocal %126 {approx = true} : vector<8x1xf32> -> vector<8x1xf32>
      %128 = vector.broadcast %127 : vector<8x1xf32> to vector<8x8xf32>
      %129 = arith.mulf %124, %128 : vector<8x8xf32>
      %130 = arith.truncf %129 : vector<8x8xf32> to vector<8x8xbf16>
      %cst_72 = arith.constant dense<0.000000e+00> : vector<8x8xf32>
      %131 = tpu.matmul %130, %116, %cst_72 {dimension_numbers = #tpu.dot_dimension_numbers<[1], [0], [0], [1], [0, 0, 1, 1], [], []>} : vector<8x8xbf16>, vector<8x8xbf16>, vector<8x8xf32> -> vector<8x8xf32>
      %c0_73 = arith.constant 0 : index
      %c0_74 = arith.constant 0 : index
      %132 = vector.load %arg27[%c0_73, %c0_74] : memref<8x32xf32, #tpu.memory_space<vmem>>, vector<8x32xf32>
      %133 = arith.truncf %131 : vector<8x8xf32> to vector<8x8xbf16>
      %134 = arith.index_cast %arg28 : i32 to index
      %c0_75 = arith.constant 0 : index
      %c0_76 = arith.constant 0 : index
      %135 = vector.load %arg13[%134, %c0_75, %c0_76] : memref<4x8x32xbf16, #tpu.memory_space<vmem>>, vector<1x8x32xbf16>
      %136 = vector.shape_cast %135 : vector<1x8x32xbf16> to vector<8x32xbf16>
      %cst_77 = arith.constant dense<0.000000e+00> : vector<8x32xf32>
      %137 = tpu.matmul %133, %136, %cst_77 {dimension_numbers = #tpu.dot_dimension_numbers<[1], [0], [0], [1], [0, 0, 1, 1], [], []>} : vector<8x8xbf16>, vector<8x32xbf16>, vector<8x32xf32> -> vector<8x32xf32>
      %138 = arith.addf %132, %137 : vector<8x32xf32>
      %c0_78 = arith.constant 0 : index
      %c0_79 = arith.constant 0 : index
      %139 = vector.load %arg27[%c0_78, %c0_79] : memref<8x32xf32, #tpu.memory_space<vmem>>, vector<8x32xf32>
      tpu.vector_store %arg27[%c0_78, %c0_79], %138 {strides = array<i32>} : memref<8x32xf32, #tpu.memory_space<vmem>>, vector<8x32xf32>,
    }
    %c4_i32_26 = arith.constant 4 : i32
    %c0_27 = arith.constant 0 : index
    %c0_28 = arith.constant 0 : index
    %37 = vector.load %arg27[%c0_27, %c0_28] : memref<8x32xf32, #tpu.memory_space<vmem>>, vector<8x32xf32>
    %c0_29 = arith.constant 0 : index
    %c0_30 = arith.constant 0 : index
    %38 = vector.load %arg14[%c0_29, %c0_30] : memref<1x32xf32, #tpu.memory_space<vmem>>, vector<1x32xf32>
    %39 = vector.broadcast %38 : vector<1x32xf32> to vector<8x32xf32>
    %40 = arith.addf %37, %39 : vector<8x32xf32>
    %41 = arith.addf %4, %40 : vector<8x32xf32>
    %cst_31 = arith.constant dense<0.000000e+00> : vector<8xf32>
    %42 = vector.multi_reduction <add>, %41, %cst_31 [1] : vector<8x32xf32> to vector<8xf32>
    %43 = vector.shape_cast %42 : vector<8xf32> to vector<8x1xf32>
    %cst_32 = arith.constant 3.200000e+01 : f32
    %44 = vector.broadcast %cst_32 : f32 to vector<8x1xf32>
    %45 = arith.divf %43, %44 : vector<8x1xf32>
    %46 = vector.broadcast %45 : vector<8x1xf32> to vector<8x32xf32>
    %47 = arith.subf %41, %46 : vector<8x32xf32>
    %48 = arith.mulf %47, %47 : vector<8x32xf32>
    %cst_33 = arith.constant dense<0.000000e+00> : vector<8xf32>
    %49 = vector.multi_reduction <add>, %48, %cst_33 [1] : vector<8x32xf32> to vector<8xf32>
    %50 = vector.shape_cast %49 : vector<8xf32> to vector<8x1xf32>
    %cst_34 = arith.constant 3.200000e+01 : f32
    %51 = vector.broadcast %cst_34 : f32 to vector<8x1xf32>
    %52 = arith.divf %50, %51 : vector<8x1xf32>
    %53 = vector.broadcast %45 : vector<8x1xf32> to vector<8x32xf32>
    %54 = arith.subf %41, %53 : vector<8x32xf32>
    %cst_35 = arith.constant 9.99999974E-6 : f32
    %55 = vector.broadcast %cst_35 : f32 to vector<8x1xf32>
    %56 = arith.addf %52, %55 : vector<8x1xf32>
    %57 = math.rsqrt %56 : vector<8x1xf32>
    %58 = vector.broadcast %57 : vector<8x1xf32> to vector<8x32xf32>
    %59 = arith.mulf %54, %58 : vector<8x32xf32>
    %c0_36 = arith.constant 0 : index
    %c0_37 = arith.constant 0 : index
    %60 = vector.load %arg15[%c0_36, %c0_37] : memref<1x32xf32, #tpu.memory_space<vmem>>, vector<1x32xf32>
    %61 = vector.broadcast %60 : vector<1x32xf32> to vector<8x32xf32>
    %62 = arith.mulf %59, %61 : vector<8x32xf32>
    %c0_38 = arith.constant 0 : index
    %c0_39 = arith.constant 0 : index
    %63 = vector.load %arg16[%c0_38, %c0_39] : memref<1x32xf32, #tpu.memory_space<vmem>>, vector<1x32xf32>
    %64 = vector.broadcast %63 : vector<1x32xf32> to vector<8x32xf32>
    %65 = arith.addf %62, %64 : vector<8x32xf32>
    %66 = arith.truncf %65 : vector<8x32xf32> to vector<8x32xbf16>
    %c0_40 = arith.constant 0 : index
    %c0_41 = arith.constant 0 : index
    %67 = vector.load %arg17[%c0_40, %c0_41] : memref<32x64xbf16, #tpu.memory_space<vmem>>, vector<32x64xbf16>
    %cst_42 = arith.constant dense<0.000000e+00> : vector<8x64xf32>
    %68 = tpu.matmul %66, %67, %cst_42 {dimension_numbers = #tpu.dot_dimension_numbers<[1], [0], [0], [1], [0, 0, 1, 1], [], []>} : vector<8x32xbf16>, vector<32x64xbf16>, vector<8x64xf32> -> vector<8x64xf32>
    %c0_43 = arith.constant 0 : index
    %c0_44 = arith.constant 0 : index
    %69 = vector.load %arg18[%c0_43, %c0_44] : memref<1x64xf32, #tpu.memory_space<vmem>>, vector<1x64xf32>
    %70 = vector.broadcast %69 : vector<1x64xf32> to vector<8x64xf32>
    %71 = arith.addf %68, %70 : vector<8x64xf32>
    %cst_45 = arith.constant 0.000000e+00 : f32
    %72 = vector.broadcast %cst_45 : f32 to vector<8x64xf32>
    %73 = arith.maximumf %71, %72 : vector<8x64xf32>
    %74 = arith.truncf %73 : vector<8x64xf32> to vector<8x64xbf16>
    %c0_46 = arith.constant 0 : index
    %c0_47 = arith.constant 0 : index
    %75 = vector.load %arg19[%c0_46, %c0_47] : memref<64x32xbf16, #tpu.memory_space<vmem>>, vector<64x32xbf16>
    %cst_48 = arith.constant dense<0.000000e+00> : vector<8x32xf32>
    %76 = tpu.matmul %74, %75, %cst_48 {dimension_numbers = #tpu.dot_dimension_numbers<[1], [0], [0], [1], [0, 0, 1, 1], [], []>} : vector<8x64xbf16>, vector<64x32xbf16>, vector<8x32xf32> -> vector<8x32xf32>
    %c0_49 = arith.constant 0 : index
    %c0_50 = arith.constant 0 : index
    %77 = vector.load %arg20[%c0_49, %c0_50] : memref<1x32xf32, #tpu.memory_space<vmem>>, vector<1x32xf32>
    %78 = vector.broadcast %77 : vector<1x32xf32> to vector<8x32xf32>
    %79 = arith.addf %76, %78 : vector<8x32xf32>
    %80 = arith.addf %65, %79 : vector<8x32xf32>
    %cst_51 = arith.constant dense<0.000000e+00> : vector<8xf32>
    %81 = vector.multi_reduction <add>, %80, %cst_51 [1] : vector<8x32xf32> to vector<8xf32>
    %82 = vector.shape_cast %81 : vector<8xf32> to vector<8x1xf32>
    %cst_52 = arith.constant 3.200000e+01 : f32
    %83 = vector.broadcast %cst_52 : f32 to vector<8x1xf32>
    %84 = arith.divf %82, %83 : vector<8x1xf32>
    %85 = vector.broadcast %84 : vector<8x1xf32> to vector<8x32xf32>
    %86 = arith.subf %80, %85 : vector<8x32xf32>
    %87 = arith.mulf %86, %86 : vector<8x32xf32>
    %cst_53 = arith.constant dense<0.000000e+00> : vector<8xf32>
    %88 = vector.multi_reduction <add>, %87, %cst_53 [1] : vector<8x32xf32> to vector<8xf32>
    %89 = vector.shape_cast %88 : vector<8xf32> to vector<8x1xf32>
    %cst_54 = arith.constant 3.200000e+01 : f32
    %90 = vector.broadcast %cst_54 : f32 to vector<8x1xf32>
    %91 = arith.divf %89, %90 : vector<8x1xf32>
    %92 = vector.broadcast %84 : vector<8x1xf32> to vector<8x32xf32>
    %93 = arith.subf %80, %92 : vector<8x32xf32>
    %cst_55 = arith.constant 9.99999974E-6 : f32
    %94 = vector.broadcast %cst_55 : f32 to vector<8x1xf32>
    %95 = arith.addf %91, %94 : vector<8x1xf32>
    %96 = math.rsqrt %95 : vector<8x1xf32>
    %97 = vector.broadcast %96 : vector<8x1xf32> to vector<8x32xf32>
    %98 = arith.mulf %93, %97 : vector<8x32xf32>
    %c0_56 = arith.constant 0 : index
    %c0_57 = arith.constant 0 : index
    %99 = vector.load %arg21[%c0_56, %c0_57] : memref<1x32xf32, #tpu.memory_space<vmem>>, vector<1x32xf32>
    %100 = vector.broadcast %99 : vector<1x32xf32> to vector<8x32xf32>
    %101 = arith.mulf %98, %100 : vector<8x32xf32>
    %c0_58 = arith.constant 0 : index
    %c0_59 = arith.constant 0 : index
    %102 = vector.load %arg22[%c0_58, %c0_59] : memref<1x32xf32, #tpu.memory_space<vmem>>, vector<1x32xf32>
    %103 = vector.broadcast %102 : vector<1x32xf32> to vector<8x32xf32>
    %104 = arith.addf %101, %103 : vector<8x32xf32>
    %c0_60 = arith.constant 0 : index
    %c0_61 = arith.constant 0 : index
    %c0_62 = arith.constant 0 : index
    %105 = vector.load %arg23[%c0_60, %c0_61, %c0_62] : memref<1x8x32xf32, #tpu.memory_space<vmem>>, vector<1x8x32xf32>
    %106 = vector.shape_cast %105 : vector<1x8x32xf32> to vector<8x32xf32>
    %107 = vector.shape_cast %104 : vector<8x32xf32> to vector<1x8x32xf32>
    tpu.vector_store %arg23[%c0_60, %c0_61, %c0_62], %107 {strides = array<i32>} : memref<1x8x32xf32, #tpu.memory_space<vmem>>, vector<1x8x32xf32>,
    return
  }
  func.func @transform_0(%arg0: i32, %arg1: i32) -> (i32, i32, i32) {
    %c0_i32 = arith.constant 0 : i32
    %c0_i32_0 = arith.constant 0 : i32
    return %arg0, %arg1, %c0_i32 : i32, i32, i32
  }
  func.func @transform_1(%arg0: i32, %arg1: i32) -> (i32, i32, i32) {
    %c0_i32 = arith.constant 0 : i32
    %c0_i32_0 = arith.constant 0 : i32
    %c0_i32_1 = arith.constant 0 : i32
    return %arg0, %c0_i32, %c0_i32_0 : i32, i32, i32
  }
  func.func @transform_2(%arg0: i32, %arg1: i32) -> (i32, i32, i32) {
    %c0_i32 = arith.constant 0 : i32
    %c0_i32_0 = arith.constant 0 : i32
    %c0_i32_1 = arith.constant 0 : i32
    return %arg0, %c0_i32, %c0_i32_0 : i32, i32, i32
  }
  func.func @transform_3(%arg0: i32, %arg1: i32) -> (i32, i32, i32) {
    %c0_i32 = arith.constant 0 : i32
    %c0_i32_0 = arith.constant 0 : i32
    return %arg0, %arg1, %c0_i32 : i32, i32, i32
  }
  func.func @transform_4(%arg0: i32, %arg1: i32) -> (i32, i32, i32) {
    %c0_i32 = arith.constant 0 : i32
    %c0_i32_0 = arith.constant 0 : i32
    return %arg0, %arg1, %c0_i32 : i32, i32, i32
  }
  func.func @transform_5(%arg0: i32, %arg1: i32) -> (i32, i32) {
    %c0_i32 = arith.constant 0 : i32
    %c0_i32_0 = arith.constant 0 : i32
    %c0_i32_1 = arith.constant 0 : i32
    return %c0_i32, %c0_i32_0 : i32, i32
  }
  func.func @transform_6(%arg0: i32, %arg1: i32) -> (i32, i32) {
    %c0_i32 = arith.constant 0 : i32
    %c0_i32_0 = arith.constant 0 : i32
    %c0_i32_1 = arith.constant 0 : i32
    return %c0_i32, %c0_i32_0 : i32, i32
  }
  func.func @transform_7(%arg0: i32, %arg1: i32) -> (i32, i32) {
    %c0_i32 = arith.constant 0 : i32
    %c0_i32_0 = arith.constant 0 : i32
    %c0_i32_1 = arith.constant 0 : i32
    return %c0_i32, %c0_i32_0 : i32, i32
  }
  func.func @transform_8(%arg0: i32, %arg1: i32) -> (i32, i32) {
    %c0_i32 = arith.constant 0 : i32
    %c0_i32_0 = arith.constant 0 : i32
    %c0_i32_1 = arith.constant 0 : i32
    return %c0_i32, %c0_i32_0 : i32, i32
  }
  func.func @transform_9(%arg0: i32, %arg1: i32) -> (i32, i32) {
    %c0_i32 = arith.constant 0 : i32
    %c0_i32_0 = arith.constant 0 : i32
    %c0_i32_1 = arith.constant 0 : i32
    return %c0_i32, %c0_i32_0 : i32, i32
  }
  func.func @transform_10(%arg0: i32, %arg1: i32) -> (i32, i32) {
    %c0_i32 = arith.constant 0 : i32
    %c0_i32_0 = arith.constant 0 : i32
    %c0_i32_1 = arith.constant 0 : i32
    return %c0_i32, %c0_i32_0 : i32, i32
  }
  func.func @transform_11(%arg0: i32, %arg1: i32) -> (i32, i32, i32) {
    %c0_i32 = arith.constant 0 : i32
    %c0_i32_0 = arith.constant 0 : i32
    %c0_i32_1 = arith.constant 0 : i32
    %c0_i32_2 = arith.constant 0 : i32
    return %c0_i32, %c0_i32_0, %c0_i32_1 : i32, i32, i32
  }
  func.func @transform_12(%arg0: i32, %arg1: i32) -> (i32, i32) {
    %c0_i32 = arith.constant 0 : i32
    %c0_i32_0 = arith.constant 0 : i32
    %c0_i32_1 = arith.constant 0 : i32
    return %c0_i32, %c0_i32_0 : i32, i32
  }
  func.func @transform_13(%arg0: i32, %arg1: i32) -> (i32, i32) {
    %c0_i32 = arith.constant 0 : i32
    %c0_i32_0 = arith.constant 0 : i32
    %c0_i32_1 = arith.constant 0 : i32
    return %c0_i32, %c0_i32_0 : i32, i32
  }
  func.func @transform_14(%arg0: i32, %arg1: i32) -> (i32, i32) {
    %c0_i32 = arith.constant 0 : i32
    %c0_i32_0 = arith.constant 0 : i32
    %c0_i32_1 = arith.constant 0 : i32
    return %c0_i32, %c0_i32_0 : i32, i32
  }
  func.func @transform_15(%arg0: i32, %arg1: i32) -> (i32, i32) {
    %c0_i32 = arith.constant 0 : i32
    %c0_i32_0 = arith.constant 0 : i32
    %c0_i32_1 = arith.constant 0 : i32
    return %c0_i32, %c0_i32_0 : i32, i32
  }
  func.func @transform_16(%arg0: i32, %arg1: i32) -> (i32, i32) {
    %c0_i32 = arith.constant 0 : i32
    %c0_i32_0 = arith.constant 0 : i32
    %c0_i32_1 = arith.constant 0 : i32
    return %c0_i32, %c0_i32_0 : i32, i32
  }
  func.func @transform_17(%arg0: i32, %arg1: i32) -> (i32, i32) {
    %c0_i32 = arith.constant 0 : i32
    %c0_i32_0 = arith.constant 0 : i32
    %c0_i32_1 = arith.constant 0 : i32
    return %c0_i32, %c0_i32_0 : i32, i32
  }
  func.func @transform_18(%arg0: i32, %arg1: i32) -> (i32, i32) {
    %c0_i32 = arith.constant 0 : i32
    %c0_i32_0 = arith.constant 0 : i32
    %c0_i32_1 = arith.constant 0 : i32
    return %c0_i32, %c0_i32_0 : i32, i32
  }
  func.func @transform_19(%arg0: i32, %arg1: i32) -> (i32, i32) {
    %c0_i32 = arith.constant 0 : i32
    %c0_i32_0 = arith.constant 0 : i32
    %c0_i32_1 = arith.constant 0 : i32
    return %c0_i32, %c0_i32_0 : i32, i32
  }
  func.func @transform_20(%arg0: i32, %arg1: i32) -> (i32, i32) {
    %c0_i32 = arith.constant 0 : i32
    %c0_i32_0 = arith.constant 0 : i32
    %c0_i32_1 = arith.constant 0 : i32
    return %c0_i32, %c0_i32_0 : i32, i32
  }
  func.func @transform_21(%arg0: i32, %arg1: i32) -> (i32, i32, i32) {
    %c0_i32 = arith.constant 0 : i32
    %c0_i32_0 = arith.constant 0 : i32
    return %arg0, %arg1, %c0_i32 : i32, i32, i32
  }
}

</mosaic_0001>

<bundles_post_ra>
// kernel: tpu_custom_call.1
= control target key start
LH: loop header
LB: loop body
LE: loop exit
PB: predicated region body
PF: predicated region fallthrough
CT: control target
= control target key end

     0   :  { %s3209_s0 = inlined_call_operand.vmem [shape: f32[2,8,32], index: 0, kind: input, shape index: {}]   ;;  %s3210_s1 = inlined_call_operand.hbm [shape: bf16[2,8,32], index: 1, kind: input, shape index: {}]   ;;  %s3211_s2 = inlined_call_operand.hbm [shape: bf16[2,8,32], index: 2, kind: input, shape index: {}]   ;;  %s3212_s3 = inlined_call_operand.hbm [shape: bf16[2,8,8], index: 3, kind: input, shape index: {}]   ;;  %s3213_s4 = inlined_call_operand.hbm [shape: bf16[2,8,8], index: 4, kind: input, shape index: {}]   ;;  %s3214_s5 = inlined_call_operand.vmem [shape: bf16[32,32], index: 5, kind: input, shape index: {}]   ;;  %s3215_s6 = inlined_call_operand.vmem [shape: f32[1,32], index: 6, kind: input, shape index: {}]   ;;  %s3216_s7 = inlined_call_operand.vmem [shape: bf16[32,32], index: 7, kind: input, shape index: {}]   ;;  %s3217_s8 = inlined_call_operand.hbm [shape: f32[1,32], index: 8, kind: input, shape index: {}]   ;;  %s3218_s9 = inlined_call_operand.vmem [shape: bf16[32,32], index: 9, kind: input, shape index: {}]   ;;  %s3219_s10 = inlined_call_operand.hbm [shape: f32[1,32], index: 10, kind: input, shape index: {}]   ;;  %s3220_s11 = inlined_call_operand.hbm [shape: bf16[4,8,32], index: 11, kind: input, shape index: {}]   ;;  %s3221_s12 = inlined_call_operand.hbm [shape: f32[1,32], index: 12, kind: input, shape index: {}]   ;;  %s3222_s13 = inlined_call_operand.hbm [shape: f32[1,32], index: 13, kind: input, shape index: {}]   ;;  %s3223_s14 = inlined_call_operand.vmem [shape: f32[1,32], index: 14, kind: input, shape index: {}]   ;;  %s3224_s15 = inlined_call_operand.vmem [shape: bf16[32,64], index: 15, kind: input, shape index: {}]   ;;  %s3225_s16 = inlined_call_operand.vmem [shape: f32[1,64], index: 16, kind: input, shape index: {}]   ;;  %s3226_s17 = inlined_call_operand.vmem [shape: bf16[64,32], index: 17, kind: input, shape index: {}]   ;;  %s3227_s18 = inlined_call_operand.vmem [shape: f32[1,32], index: 18, kind: input, shape index: {}]   ;;  %s3228_s19 = inlined_call_operand.vmem [shape: f32[1,32], index: 19, kind: input, shape index: {}]   ;;  %s3229_s20 = inlined_call_operand.vmem [shape: f32[1,32], index: 20, kind: input, shape index: {}]   ;;  %s3230_s21 = inlined_call_operand.hbm [shape: f32[2,8,32], index: 21, kind: output, shape index: {}]  }
   0x1   :  { %3265 = sst [smem:[#allocation37_spill]] %s3209_s0 }
   0x2   :  { %3266 = sst [smem:[#allocation38_spill]] %s3210_s1 }
   0x3   :  { %3267 = sst [smem:[#allocation39_spill]] %s3211_s2 }
   0x4   :  { %3268 = sst [smem:[#allocation40_spill]] %s3212_s3 }
   0x5   :  { %3269 = sst [smem:[#allocation41_spill]] %s3213_s4 }
   0x6   :  { %3270 = sst [smem:[#allocation42_spill]] %s3214_s5 }
   0x7   :  { %3271 = sst [smem:[#allocation43_spill]] %s3215_s6 }
   0x8   :  { %3272 = sst [smem:[#allocation44_spill]] %s3216_s7 }
   0x9   :  { %3273 = sst [smem:[#allocation45_spill]] %s3217_s8 }
   0xa   :  { %3274 = sst [smem:[#allocation46_spill]] %s3218_s9 }
   0xb   :  { %3275 = sst [smem:[#allocation47_spill]] %s3219_s10 }
   0xc   :  { %3276 = sst [smem:[#allocation48_spill]] %s3221_s12 }
   0xd   :  { %3277 = sst [smem:[#allocation49_spill]] %s3223_s14 }
   0xe   :  { %3278 = sst [smem:[#allocation50_spill]] %s3224_s15 }
   0xf   :  { %3279 = sst [smem:[#allocation51_spill]] %s3225_s16 }
  0x10   :  { %3280 = sst [smem:[#allocation52_spill]] %s3226_s17 }
  0x11   :  { %3281 = sst [smem:[#allocation53_spill]] %s3227_s18 }
  0x12   :  { %3282 = sst [smem:[#allocation54_spill]] %s3228_s19 }
  0x13   :  { %3283 = sst [smem:[#allocation55_spill]] %s3229_s20 }
  0x14   :  { %3284 = sst [smem:[#allocation56_spill]] %s3230_s21 }
  0x15   :  { %26 = vsyncpa [#allocation7], 0 }
  0x16   :  { %28 = vsyncpa [#allocation7 + $0x1], 0 }
  0x17   :  { %29 = vsyncpa [#allocation10], 0 }
  0x18   :  { %31 = vsyncpa [#allocation10 + $0x1], 0 }
  0x19   :  { %32 = vsyncpa [#allocation13], 0 }
  0x1a   :  { %34 = vsyncpa [#allocation13 + $0x1], 0 }
  0x1b   :  { %35 = vsyncpa [#allocation16], 0 }
  0x1c   :  { %36 = vsyncpa [#allocation19], 0 }
  0x1d   :  { %37 = vsyncpa [#allocation8], 0 }
  0x1e   :  { %39 = vsyncpa [#allocation8 + $0x1], 0  ;;  %s2628_s2 = smov 0   ;;  %s2630_s25 = smov 0  }
  0x1f   :  { %s2632_s26 = smov 0   ;;  %s2634_s27 = smov 0  }
  0x20   :  { %s2636_s3 = smov 0   ;;  %s2638_s28 = smov 0  }
  0x21 LB: > { %3285 = sst [smem:[#allocation29_spill]] %s2473_s2  ;;  %s2659_s29 = sadd.s32 4294967295, %s2493_s28   ;;  %s2493_s28 = sphi %s2638_s28, %s45_s28   ;;  %s2489_s3 = sphi %s2636_s3, %s3352_s3   ;;  %s2485_s27 = sphi %s2634_s27, %s3351_s27   ;;  %s2481_s26 = sphi %s2632_s26, %s3355_s26   ;;  %s2477_s25 = sphi %s2630_s25, %s3354_s25   ;;  %s2473_s2 = sphi %s2628_s2, %s3353_s2  }
  0x22   : > { %3286 = sst [smem:[#allocation30_spill]] %s2485_s27  ;;  %p1806_p0 = scmp.ge.s32.totalorder %s2493_s28, 1 }
  0x23   : > { %3287 = sst [smem:[#allocation31_spill]] %s2489_s3  ;;  %p3237_p1 = scmp.eq.s32.totalorder %s2659_s29, 0 }
  0x24   : > { %3288 = sst [smem:[#allocation32_spill]] %s2659_s29  ;;  %p562_p2 = scmp.lt.s32.totalorder %s2493_s28, 3 }
  0x25   : > { %s2499_s4 = smov [#allocation14]   ;;  %s2500_s5 = smov [#allocation15]  }
  0x26   : > { %p2664_p3 = pnand %p1806_p0, %p562_p2  ;;  %s584_s30 = sshll.u32 %s2499_s4, 4  ;;  %s585_s30 = int_to_ptr.vmem [resolvable:$true] %s584_s30 }
  0x27   : > { %s598_s22 = sshll.u32 %s2500_s5, 4  ;;  %s2501_s1 = smov [#allocation18]   ;;  %s2677_s22 = int_to_ptr.vmem [resolvable:$true] %s598_s22 }
  0x28   : > { %s3289_s0 = scalar_select %p2664_p3, 1, 0 }
  0x29   : > { %p1992_p5 = pneg %p2664_p3  ;;  %s622_s24 = sshll.u32 %s2501_s1, 4  ;;  %s2679_s24 = int_to_ptr.vmem [resolvable:$true] %s622_s24 }
  0x2a   : > { %s3291_s8 = sld [smem:[#allocation45_spill]] }
  0x2b   : > { %p2673_p6 = pnand %p1992_p5, %p3237_p1 }
  0x2d   : > { %s3290_s23 = scalar_select %p2673_p6, 1, 0 }
  0x2e   : > { %p2689_p8 = pneg %p2673_p6 }
  0x30   : > { %s2127_s20 = scalar_lea.hbm %s3291_s8, 16 }
  0x31   : > { %p2128_p7 = scmp.ne.s32.totalorder %s3291_s8, %s2127_s20  ;;  %p2134_p11 = scmp.lt.u32.totalorder %s2127_s20, %s3291_s8 }
  0x32   : > { %s3292_s5 = scalar_select %p2689_p8, 1, 0 }
  0x33   : > { %p2130_p9 = pnand %p2689_p8, %p2128_p7 }
  0x35   : > { %p2131_p10 = pneg %p2130_p9 }
  0x37   : > { %p2136_p12 = pnand %p2134_p11, %p2131_p10 }
  0x39   : > { %2139 = shalt.err (!%p2136_p12)
}
  0x3a   : > { %s2140_s21 = scalar_lea.vmem %s585_s30, 16  ;;  %s2147_s18 = scalar_lea.vmem %s585_s30, 32 }
  0x3b   : > { %p2141_p13 = scmp.ne.s32.totalorder %s585_s30, %s2140_s21  ;;  %p2148_p5 = scmp.lt.s32.totalorder %s585_s30, %s585_s30 }
  0x3c   : > { %p2149_p4 = scmp.lt.s32.totalorder %s2147_s18, %s2140_s21 }
  0x3d   : > { %p2143_p0 = pnand %p2141_p13, %p2689_p8 }
  0x3e   : > { %p2150_p1 = por %p2149_p4, %p2148_p5 }
  0x3f   : > { %p2144_p2 = pneg %p2143_p0 }
  0x41   : > { %p2151_p3 = pnand %p2150_p1, %p2144_p2 }
  0x43   : > { %2154 = shalt.err (!%p2151_p3)
}
  0x44   : > { %1995 = dma.hbm_to_vmem [thread:$0]  (!%p2673_p6), %s3291_s8, 16, %s585_s30, [#allocation13]  }
  0x45   : > { %s3293_s10 = sld [smem:[#allocation47_spill]] }
  0x4b   : > { %s2155_s1 = scalar_lea.hbm %s3293_s10, 16 }
  0x4c   : > { %p2156_p7 = scmp.ne.s32.totalorder %s3293_s10, %s2155_s1  ;;  %p2162_p1 = scmp.lt.u32.totalorder %s2155_s1, %s3293_s10 }
  0x4e   : > { %p2158_p9 = pnand %p2156_p7, %p2689_p8 }
  0x50   : > { %p2159_p4 = pneg %p2158_p9 }
  0x52   : > { %p2164_p3 = pnand %p2162_p1, %p2159_p4 }
  0x54   : > { %2167 = shalt.err (!%p2164_p3)
}
  0x55   : > { %s2168_s30 = scalar_lea.vmem %s2677_s22, 16  ;;  %s2175_s14 = scalar_lea.vmem %s2677_s22, 32 }
  0x56   : > { %p2169_p10 = scmp.ne.s32.totalorder %s2677_s22, %s2168_s30  ;;  %p2176_p13 = scmp.lt.s32.totalorder %s2677_s22, %s2677_s22 }
  0x57   : > { %p2177_p0 = scmp.lt.s32.totalorder %s2175_s14, %s2168_s30 }
  0x58   : > { %p2171_p11 = pnand %p2169_p10, %p2689_p8 }
  0x59   : > { %p2178_p2 = por %p2177_p0, %p2176_p13 }
  0x5a   : > { %p2172_p12 = pneg %p2171_p11 }
  0x5c   : > { %p2179_p5 = pnand %p2178_p2, %p2172_p12 }
  0x5e   : > { %2182 = shalt.err (!%p2179_p5)
}
  0x5f   : > { %1998 = dma.hbm_to_vmem [thread:$0]  (!%p2673_p6), %s3293_s10, 16, %s2677_s22, [#allocation16]  }
  0x60   : > { %s3294_s12 = sld [smem:[#allocation48_spill]] }
  0x66   : > { %s2183_s20 = scalar_lea.hbm %s3294_s12, 16 }
  0x67   : > { %p2184_p7 = scmp.ne.s32.totalorder %s3294_s12, %s2183_s20  ;;  %p2190_p1 = scmp.lt.u32.totalorder %s2183_s20, %s3294_s12 }
  0x69   : > { %p2186_p9 = pnand %p2184_p7, %p2689_p8 }
  0x6b   : > { %p2187_p4 = pneg %p2186_p9 }
  0x6d   : > { %p2192_p3 = pnand %p2190_p1, %p2187_p4 }
  0x6f   : > { %2195 = shalt.err (!%p2192_p3)
}
  0x70   : > { %s2196_s22 = scalar_lea.vmem %s2679_s24, 16  ;;  %s2203_s14 = scalar_lea.vmem %s2679_s24, 32 }
  0x71   : > { %p2197_p10 = scmp.ne.s32.totalorder %s2679_s24, %s2196_s22  ;;  %p2204_p13 = scmp.lt.s32.totalorder %s2679_s24, %s2679_s24 }
  0x72   : > { %p2205_p0 = scmp.lt.s32.totalorder %s2203_s14, %s2196_s22 }
  0x73   : > { %p2199_p11 = pnand %p2197_p10, %p2689_p8 }
  0x74   : > { %p2206_p2 = por %p2205_p0, %p2204_p13 }
  0x75   : > { %p2200_p12 = pneg %p2199_p11 }
  0x77   : > { %p2207_p5 = pnand %p2206_p2, %p2200_p12 }
  0x79   : > { %2210 = shalt.err (!%p2207_p5)
}
  0x7a   : > { %2004 = dma.hbm_to_vmem [thread:$0]  (!%p2673_p6), %s3294_s12, 16, %s2679_s24, [#allocation19]  }
  0x7b   : > { %s1805_s4 = sadd.s32 4294967294, %s2493_s28   ;;  %s57_s16 = sadd.s32 1, %s2489_s3 }
  0x7c   : > { %s92_s20 = sadd.s32 1, %s2481_s26  ;;  %p59_p7 = scmp.ge.s32.totalorder %s57_s16, 2 }
  0x7d   : > { %p99_p9 = scmp.ne.s32.totalorder %s2481_s26, %s2477_s25  ;;  %p100_p4 = scmp.eq.s32.totalorder %s2493_s28, 0 }
  0x7e   : > { %p105_p1 = scmp.ne.s32.totalorder %s2477_s25, %s2473_s2  ;;  %s3357_s16 = smov (%p59_p7, %s57_s16), 0 }
  0x7f   : > { %3295 = sst [smem:[#allocation33_spill]] %s3357_s16  ;;  %p2763_p3 = por %p100_p4, %p99_p9 }
  0x80   : > { %p3297_p10 = scmp.eq.s32.totalorder %s2659_s29, 0  ;;  %s89_s21 = ssub.s32 %s2489_s3, %s3357_s16 }
  0x81   : > { %p549_p12 = scmp.eq.s32.totalorder %s2659_s29, 1  ;;  %p90_p13 = scmp.eq.s32.totalorder %s89_s21, 0 }
  0x82   : > { %p2769_p11 = por %p3297_p10, %p105_p1  ;;  %p555_p0 = scmp.eq.s32.totalorder %s1805_s4, 1 }
  0x83   : > { %p2776_p2 = por %p549_p12, %p99_p9  ;;  %p2030_p5 = scmp.lt.s32.totalorder %s2493_s28, 2 }
  0x84   : > { %s3298_s24 = scalar_select %p2769_p11, 1, 0 }
  0x85   : > { %s3299_s18 = scalar_select %p2776_p2, 1, 0 }
  0x86   : > { %s2782_s30 = scalar_select %p90_p13, %s2481_s26, %s92_s20  }
  0x87   : > { %3300 = sst [smem:[#allocation34_spill]] %s3299_s18  ;;  %p2784_p7 = por %p555_p0, %p105_p1 }
  0x88   : > { %3301 = sst [smem:[#allocation35_spill]] %s2782_s30  ;;  %s3240_s14 = sand.u32 1, %s2481_s26  }
  0x89   : > { %s3302_s22 = scalar_select %p2784_p7, 1, 0 }
  0x8a   : > { %s2791_s17 = sshll.u32 %s3240_s14, 2  ;;  %s2794_s19 = sshll.u32 %s2489_s3, 6 }
  0x8b   : > { %3303 = sst [smem:[#allocation36_spill]] %s3302_s22  ;;  %p2798_p9 = pnand %p2030_p5, %p2763_p3 }
  0x8c   : > { %s3246_s20 = sand.u32 1, %s2493_s28   ;;  %s3305_s10 = sld [smem:[#allocation39_spill]] }
  0x8d   : > { %s3304_s4 = scalar_select %p2798_p9, 1, 0 }
  0x8e   : > { %s697_s14 = scalar_lea.vmem [#allocation9], %s2791_s17  ;;  %s2814_s1 = scalar_lea.sflag [#allocation10], %s3246_s20 }
  0x8f   : > { %s704_s16 = sshll.u32 %s697_s14, 4  ;;  %p2820_p1 = pneg %p2798_p9  ;;  %s2810_s16 = int_to_ptr.vmem [resolvable:$true] %s704_s16 }
  0x91   : > { %s3306_s30 = scalar_select %p2820_p1, 1, 0 }
  0x92   : > { %s2807_s12 = scalar_lea.hbm %s3305_s10, %s2794_s19  ;;  %s2216_s14 = scalar_lea.hbm %s3305_s10, 128 }
  0x93   : > { %s2211_s3 = scalar_lea.hbm %s2807_s12, 64  ;;  %p2217_p12 = scmp.lt.u32.totalorder %s2807_s12, %s3305_s10 }
  0x94   : > { %p2212_p4 = scmp.ne.s32.totalorder %s2807_s12, %s2211_s3  ;;  %p2218_p13 = scmp.lt.u32.totalorder %s2216_s14, %s2211_s3 }
  0x95   : > { %p2220_p5 = scmp.lt.u32.totalorder %s2211_s3, %s2807_s12 }
  0x96   : > { %p2214_p3 = pnand %p2820_p1, %p2212_p4  ;;  %p2219_p0 = por %p2218_p13, %p2217_p12 }
  0x98   : > { %p2215_p10 = pneg %p2214_p3  ;;  %p2221_p7 = por %p2220_p5, %p2219_p0 }
  0x9a   : > { %p2222_p2 = pnand %p2221_p7, %p2215_p10 }
  0x9c   : > { %2225 = shalt.err (!%p2222_p2)
}
  0x9d   : > { %s2226_s20 = scalar_lea.vmem %s2810_s16, 64  ;;  %s2502_s8 = smov [#allocation9]  }
  0x9e   : > { %p2227_p4 = scmp.ne.s32.totalorder %s2810_s16, %s2226_s20  ;;  %s2231_s21 = sshll.u32 %s2502_s8, 4  ;;  %s2232_s21 = int_to_ptr.vmem [resolvable:$false] %s2231_s21 }
  0x9f   : > { %s2233_s2 = scalar_lea.vmem %s2232_s21, 128  ;;  %p2234_p6 = scmp.lt.s32.totalorder %s2810_s16, %s2232_s21 }
  0xa0   : > { %p2229_p3 = pnand %p2227_p4, %p2820_p1  ;;  %p2235_p8 = scmp.lt.s32.totalorder %s2233_s2, %s2226_s20 }
  0xa2   : > { %p2230_p11 = pneg %p2229_p3  ;;  %p2236_p12 = por %p2235_p8, %p2234_p6 }
  0xa4   : > { %p2237_p13 = pnand %p2236_p12, %p2230_p11 }
  0xa6   : > { %2240 = shalt.err (!%p2237_p13)
}
  0xa7   : > { %2014 = dma.hbm_to_vmem [thread:$0]  (!%p2798_p9), %s2807_s12, 64, %s2810_s16, %s2814_s1  }
  0xa8   : > { %s2503_s3 = smov [#allocation17]   ;;  %s2241_s8 = scalar_lea.hbm %s3220_s11, 256 }
  0xa9   : > { %s608_s22 = sshll.u32 %s2503_s3, 4  ;;  %p2242_p6 = scmp.ne.s32.totalorder %s3220_s11, %s2241_s8  ;;  %s609_s22 = int_to_ptr.vmem [resolvable:$true] %s608_s22 }
  0xaa   : > { %p3307_p8 = scmp.ne.s32.totalorder %s3292_s5, 0  ;;  %p2248_p7 = scmp.lt.u32.totalorder %s2241_s8, %s3220_s11 }
  0xac   : > { %p2244_p11 = pnand %p2242_p6, %p3307_p8 }
  0xae   : > { %p2245_p2 = pneg %p2244_p11 }
  0xb0   : > { %p2250_p10 = pnand %p2248_p7, %p2245_p2 }
  0xb2   : > { %2253 = shalt.err (!%p2250_p10)
}
  0xb3   : > { %s2254_s12 = scalar_lea.vmem %s609_s22, 256  ;;  %p2262_p3 = scmp.lt.s32.totalorder %s609_s22, %s609_s22 }
  0xb4   : > { %p2255_p0 = scmp.ne.s32.totalorder %s609_s22, %s2254_s12  ;;  %p2263_p12 = scmp.lt.s32.totalorder %s2254_s12, %s2254_s12 }
  0xb6   : > { %p2257_p5 = pnand %p2255_p0, %p3307_p8  ;;  %p2264_p13 = por %p2263_p12, %p2262_p3 }
  0xb8   : > { %p2258_p4 = pneg %p2257_p5 }
  0xba   : > { %p2265_p9 = pnand %p2264_p13, %p2258_p4 }
  0xbc   : > { %2268 = shalt.err (!%p2265_p9)
}
  0xbd   : > { %s2504_s10 = smov 64   ;;  %s2505_s16 = smov 4  }
  0xbe   : > { %p3308_p6 = scmp.ne.s32.totalorder %s3290_s23, 0  ;;  %s2506_s14 = smov [#allocation20]  }
  0xbf   : > { %s633_s8 = sshll.u32 %s2506_s14, 4  ;;  %s3309_s2 = sld [smem:[#allocation38_spill]]  ;;  %s634_s8 = int_to_ptr.vmem [resolvable:$true] %s633_s8 }
  0xc0   : > { %2001 = dma.hbm_to_vmem [thread:$0]  (!%p3308_p6), %s3220_s11, 256, %s609_s22, [#allocation16], %s2504_s10, %s2504_s10, %s2505_s16  }
  0xc1   : > { %s2269_s7 = scalar_lea.hbm %s3222_s13, 16 }
  0xc2   : > { %p2270_p9 = scmp.ne.s32.totalorder %s3222_s13, %s2269_s7  ;;  %p2276_p7 = scmp.lt.u32.totalorder %s2269_s7, %s3222_s13 }
  0xc4   : > { %p2272_p11 = pnand %p2270_p9, %p3307_p8 }
  0xc5   : > { %s3310_s15 = smov %s3309_s2  ;;  %s2866_s12 = scalar_lea.hbm %s3309_s2, %s2794_s19 }
  0xc6   : > { %p2273_p2 = pneg %p2272_p11 }
  0xc8   : > { %p2278_p10 = pnand %p2276_p7, %p2273_p2 }
  0xca   : > { %2281 = shalt.err (!%p2278_p10)
}
  0xcb   : > { %s2282_s16 = scalar_lea.vmem %s634_s8, 16  ;;  %s2289_s6 = scalar_lea.vmem %s634_s8, 32 }
  0xcc   : > { %p2283_p0 = scmp.ne.s32.totalorder %s634_s8, %s2282_s16  ;;  %p2290_p3 = scmp.lt.s32.totalorder %s634_s8, %s634_s8 }
  0xcd   : > { %p2291_p12 = scmp.lt.s32.totalorder %s2289_s6, %s2282_s16 }
  0xce   : > { %p2285_p5 = pnand %p2283_p0, %p3307_p8 }
  0xcf   : > { %p2292_p13 = por %p2291_p12, %p2290_p3 }
  0xd0   : > { %p2286_p4 = pneg %p2285_p5 }
  0xd2   : > { %p2293_p1 = pnand %p2292_p13, %p2286_p4 }
  0xd4   : > { %2296 = shalt.err (!%p2293_p1)
}
  0xd5   : > { %2007 = dma.hbm_to_vmem [thread:$0]  (!%p3308_p6), %s3222_s13, 16, %s634_s8, [#allocation19]  }
  0xd6   : > { %s679_s7 = scalar_lea.vmem [#allocation6], %s2791_s17  ;;  %s3311_s3 = sld [smem:[#allocation40_spill]] }
  0xd7   : > { %s686_s29 = sshll.u32 %s679_s7, 4  ;;  %s3313_s21 = sand.u32 1, %s2481_s26   ;;  %s2887_s29 = int_to_ptr.vmem [resolvable:$true] %s686_s29 }
  0xd8   : > { %s676_s20 = scalar_lea.sflag [#allocation7], %s3313_s21  ;;  %s2297_s2 = scalar_lea.hbm %s2866_s12, 64 }
  0xd9   : > { %p2298_p1 = scmp.ne.s32.totalorder %s2866_s12, %s2297_s2  ;;  %p3314_p8 = scmp.ne.s32.totalorder %s3306_s30, 0 }
  0xda   : > { %s2302_s8 = scalar_lea.hbm %s3310_s15, 128  ;;  %p2303_p6 = scmp.lt.u32.totalorder %s2866_s12, %s3310_s15 }
  0xdb   : > { %p2300_p9 = pnand %p2298_p1, %p3314_p8  ;;  %p2304_p2 = scmp.lt.u32.totalorder %s2302_s8, %s2297_s2 }
  0xdc   : > { %s3312_s14 = smov %s3311_s3  ;;  %s2893_s23 = scalar_lea.hbm %s3311_s3, %s2794_s19 }
  0xdd   : > { %p2301_p11 = pneg %p2300_p9  ;;  %p2305_p7 = por %p2304_p2, %p2303_p6 }
  0xde   : > { %p2306_p10 = scmp.lt.u32.totalorder %s2297_s2, %s2866_s12 }
  0xe0   : > { %p2307_p0 = por %p2306_p10, %p2305_p7 }
  0xe2   : > { %p2308_p5 = pnand %p2307_p0, %p2301_p11 }
  0xe4   : > { %2311 = shalt.err (!%p2308_p5)
}
  0xe5   : > { %s2312_s9 = scalar_lea.vmem %s2887_s29, 64  ;;  %s2507_s27 = smov [#allocation6]  }
  0xe6   : > { %p2313_p4 = scmp.ne.s32.totalorder %s2887_s29, %s2312_s9  ;;  %s2317_s7 = sshll.u32 %s2507_s27, 4  ;;  %s2318_s7 = int_to_ptr.vmem [resolvable:$false] %s2317_s7 }
  0xe7   : > { %s2319_s5 = scalar_lea.vmem %s2318_s7, 128  ;;  %p2320_p13 = scmp.lt.s32.totalorder %s2887_s29, %s2318_s7 }
  0xe8   : > { %p2315_p3 = pnand %p2313_p4, %p3314_p8  ;;  %p2321_p1 = scmp.lt.s32.totalorder %s2319_s5, %s2312_s9 }
  0xea   : > { %p2316_p12 = pneg %p2315_p3  ;;  %p2322_p9 = por %p2321_p1, %p2320_p13 }
  0xec   : > { %p2323_p6 = pnand %p2322_p9, %p2316_p12 }
  0xee   : > { %2326 = shalt.err (!%p2323_p6)
}
  0xef   : > { %p3315_p11 = scmp.ne.s32.totalorder %s3304_s4, 0  ;;  %s715_s18 = scalar_lea.vmem [#allocation11], %s2791_s17 }
  0xf0   : > { %s723_s3 = sshll.u32 %s715_s18, 4  ;;  %s3316_s22 = sld [smem:[#allocation41_spill]]  ;;  %s724_s3 = int_to_ptr.vmem [resolvable:$true] %s723_s3 }
  0xf1   : > { %2011 = dma.hbm_to_vmem [thread:$0]  (!%p3315_p11), %s2866_s12, 64, %s2887_s29, %s676_s20  }
  0xf2   : > { %s2327_s8 = scalar_lea.hbm %s2893_s23, 64  ;;  %s2332_s9 = scalar_lea.hbm %s3312_s14, 128 }
  0xf3   : > { %p2328_p2 = scmp.ne.s32.totalorder %s2893_s23, %s2327_s8  ;;  %p2333_p0 = scmp.lt.u32.totalorder %s2893_s23, %s3312_s14 }
  0xf4   : > { %p2334_p5 = scmp.lt.u32.totalorder %s2332_s9, %s2327_s8  ;;  %p2336_p3 = scmp.lt.u32.totalorder %s2327_s8, %s2893_s23 }
  0xf5   : > { %p2330_p7 = pnand %p2328_p2, %p3314_p8 }
  0xf6   : > { %s2923_s10 = scalar_lea.hbm %s3316_s22, %s2794_s19  ;;  %p2335_p4 = por %p2334_p5, %p2333_p0 }
  0xf7   : > { %p2331_p10 = pneg %p2330_p7 }
  0xf8   : > { %p2337_p12 = por %p2336_p3, %p2335_p4 }
  0xfa   : > { %p2338_p13 = pnand %p2337_p12, %p2331_p10 }
  0xfc   : > { %2341 = shalt.err (!%p2338_p13)
}
  0xfd   : > { %s2342_s19 = scalar_lea.vmem %s724_s3, 64  ;;  %s2508_s12 = smov [#allocation11]  }
  0xfe   : > { %p2343_p1 = scmp.ne.s32.totalorder %s724_s3, %s2342_s19  ;;  %s2347_s29 = sshll.u32 %s2508_s12, 4  ;;  %s2348_s29 = int_to_ptr.vmem [resolvable:$false] %s2347_s29 }
  0xff   : > { %s2349_s20 = scalar_lea.vmem %s2348_s29, 128  ;;  %p2350_p2 = scmp.lt.s32.totalorder %s724_s3, %s2348_s29 }
 0x100   : > { %p2345_p9 = pnand %p2343_p1, %p3314_p8  ;;  %p2351_p7 = scmp.lt.s32.totalorder %s2349_s20, %s2342_s19 }
 0x102   : > { %p2346_p6 = pneg %p2345_p9  ;;  %p2352_p11 = por %p2351_p7, %p2350_p2 }
 0x104   : > { %p2353_p0 = pnand %p2352_p11, %p2346_p6 }
 0x106   : > { %2356 = shalt.err (!%p2353_p0)
}
 0x107   : > { %p3317_p5 = scmp.ne.s32.totalorder %s3304_s4, 0  ;;  %s734_s5 = scalar_lea.vmem [#allocation12], %s2791_s17 }
 0x108   : > { %s742_s18 = sshll.u32 %s734_s5, 4  ;;  %s3318_s21 = sand.u32 1, %s2493_s28   ;;  %s743_s18 = int_to_ptr.vmem [resolvable:$true] %s742_s18 }
 0x109   : > { %2017 = dma.hbm_to_vmem [thread:$0]  (!%p3317_p5), %s2893_s23, 64, %s724_s3, %s2814_s1  }
 0x10a   : > { %s731_s2 = scalar_lea.sflag [#allocation13], %s3318_s21  ;;  %s2357_s8 = scalar_lea.hbm %s2923_s10, 64 }
 0x10b   : > { %p2358_p11 = scmp.ne.s32.totalorder %s2923_s10, %s2357_s8  ;;  %s2362_s9 = scalar_lea.hbm %s3316_s22, 128 }
 0x10c   : > { %p2363_p3 = scmp.lt.u32.totalorder %s2923_s10, %s3316_s22  ;;  %p2364_p12 = scmp.lt.u32.totalorder %s2362_s9, %s2357_s8 }
 0x10d   : > { %p2360_p10 = pnand %p2358_p11, %p3314_p8  ;;  %p2366_p1 = scmp.lt.u32.totalorder %s2357_s8, %s2923_s10 }
 0x10e   : > { %p2365_p13 = por %p2364_p12, %p2363_p3 }
 0x10f   : > { %p2361_p4 = pneg %p2360_p10 }
 0x110   : > { %p2367_p9 = por %p2366_p1, %p2365_p13 }
 0x112   : > { %p2368_p6 = pnand %p2367_p9, %p2361_p4 }
 0x114   : > { %2371 = shalt.err (!%p2368_p6)
}
 0x115   : > { %s2372_s17 = scalar_lea.vmem %s743_s18, 64  ;;  %s2509_s1 = smov [#allocation12]  }
 0x116   : > { %p2373_p2 = scmp.ne.s32.totalorder %s743_s18, %s2372_s17  ;;  %s2377_s23 = sshll.u32 %s2509_s1, 4  ;;  %s2378_s23 = int_to_ptr.vmem [resolvable:$false] %s2377_s23 }
 0x117   : > { %s2379_s3 = scalar_lea.vmem %s2378_s23, 128  ;;  %p2380_p11 = scmp.lt.s32.totalorder %s743_s18, %s2378_s23 }
 0x118   : > { %p2375_p7 = pnand %p2373_p2, %p3314_p8  ;;  %p2381_p10 = scmp.lt.s32.totalorder %s2379_s3, %s2372_s17 }
 0x11a   : > { %p2376_p0 = pneg %p2375_p7  ;;  %p2382_p5 = por %p2381_p10, %p2380_p11 }
 0x11c   : > { %p2383_p3 = pnand %p2382_p5, %p2376_p0 }
 0x11e   : > { %2386 = shalt.err (!%p2383_p3)
}
 0x11f   : > { %p3319_p12 = scmp.ne.s32.totalorder %s3304_s4, 0  ;;  %p3320_p4 = scmp.ne.s32.totalorder %s3289_s0, 0 }
 0x120   : > { %s2966_s30 = sand.u32 (!%p3320_p4), 1, %s2477_s25   ;;  %p3321_p8 = scmp.ne.s32.totalorder (!%p3320_p4), %s3298_s24, 0 }
 0x121   : > { %2020 = dma.hbm_to_vmem [thread:$0]  (!%p3319_p12), %s2923_s10, 64, %s743_s18, %s731_s2  }
 0x122   : > { %751 = sbr.rel (%p3320_p4) target bundleno = 2741 (0xab5), region = 104  ;;  %s2969_s19 = sshll.u32 (!%p3320_p4), %s2966_s30, 2 }
 0x123   : > { %s754_s12 = scalar_lea.sflag (!%p3320_p4), [#allocation7], %s2966_s30  ;;  %s757_s29 = scalar_lea.vmem (!%p3320_p4), [#allocation6], %s2969_s19 }
 0x129   : > { %2444 = dma.done.wait (%p3321_p8), %s754_s12, 64  }
 0x12a   : > { %2446 = vsyncadd (%p3321_p8), %s754_s12, 4294967232  ;;  %s3322_s4 = sld [smem:[#allocation32_spill]]  ;;  %s766_s20 = scalar_lea.vmem [#allocation9], %s2969_s19 }
 0x130   : > { %s762_s0 = sand.u32 1, %s3322_s4  }
 0x131   : > { %s763_s10 = scalar_lea.sflag [#allocation10], %s762_s0 }
 0x132   : > { %2448 = dma.done.wait (%p3321_p8), %s763_s10, 128  }
 0x133   : > { %2450 = vsyncadd (%p3321_p8), %s763_s10, 4294967168  ;;  %s775_s5 = scalar_lea.vmem [#allocation11], %s2969_s19  ;;  %s781_s18 = scalar_lea.sflag [#allocation13], %s762_s0 }
 0x134   : > { %s784_s21 = scalar_lea.vmem [#allocation12], %s2969_s19 }
 0x135   : > { %2452 = dma.done.wait (%p3321_p8), %s781_s18, 64  }
 0x136   : > { %2454 = vsyncadd (%p3321_p8), %s781_s18, 4294967232  ;;  %p3323_p5 = scmp.eq.s32.totalorder %s3322_s4, 0 }
 0x138   : > { %2456 = dma.done.wait (%p3323_p5), [#allocation13], 16   ;;  %p3324_p13 = pmov %p3323_p5 }
 0x139   : > { %p3325_p1 = pmov %p3323_p5 }
 0x13a   : > { %2458 = vsyncadd (%p3324_p13), [#allocation13], 4294967280 }
 0x13b   : > { %2460 = dma.done.wait (%p3325_p1), [#allocation16], 272   ;;  %p3326_p9 = pmov %p3325_p1 }
 0x13c   : > { %p3327_p6 = pmov %p3325_p1 }
 0x13d   : > { %2462 = vsyncadd (%p3326_p9), [#allocation16], 4294967024 }
 0x13e   : > { %2464 = dma.done.wait (%p3327_p6), [#allocation19], 32   ;;  %p3328_p2 = pmov %p3325_p1 }
 0x13f   : > { %s3329_s24 = sld [smem:[#allocation30_spill]]  ;;  %s1831_s2 = sshll.u32 %s2966_s30, 3  ;;  %vm921_vm0 = vcmask 261120   ;;  %v2510_v0 = vmov 0.0   ;;  %vm2511_vm1 = vmmov 0   ;;  %vm966_vm2 = vcmask 60416  }
 0x140   : > { %2466 = vsyncadd (%p3328_p2), [#allocation19], 4294967264  ;;  %1900 = vmatprep.subr.bf16.mxu0 %v2510_v0  ;;  %1908 = vmatprep.subr.bf16.mxu1 %v2510_v0  ;;  %1167 = vst.msk [vmem:[#allocation5] sm:$0xff] %vm921_vm0, %v2510_v0  ;;  %v3011_v1 = vld [vmem:[%s784_s21] sm:$0xf]  ;;  %s3330_s6 = sld [smem:[#allocation44_spill]] }
 0x141   : > { %1904 = vmatprep.mubr.msk.bf16.mxu0 %vm2511_vm1, %v2510_v0  ;;  %1912 = vmatprep.mubr.msk.bf16.mxu1 %vm2511_vm1, %v2510_v0  ;;  %v3013_v2 = vld [vmem:[%s775_s5] sm:$0xf]  ;;  %v1164_v3 = vunpack.c.l.bf16 %v3011_v1  ;;  %s3331_s1 = sld [smem:[#allocation46_spill]]  ;;  %v897_v9 = vld [vmem:[%s757_s29] sm:$0xf]  ;;  %s3332_s10 = sld [smem:[#allocation42_spill]] }
 0x142   : > { %v1166_v4 = vunpack.c.l.bf16 %v3013_v2  ;;  %s3333_s21 = sld [smem:[#allocation37_spill]]  ;;  %v986_v11 = vld [vmem:[%s766_s20] sm:$0xf]  ;;  %v1833_v15 = vld [vmem:[#allocation14] ss:$0 sm:$0xff]  ;;  %s2512_s19 = smov 104  }
 0x143   : > { %v1838_v17 = vld [vmem:[#allocation15] ss:$0 sm:$0xff]  ;;  %s2513_s29 = smov 120   ;;  %s3334_s27 = sld [smem:[#allocation43_spill]] }
 0x144   : > { %s2514_s7 = smov 112   ;;  %s3073_s17 = scalar_lea.vmem [#allocation21], %s1831_s2 }
 0x145   : > { %p885_p7 = scmp.lt.s32.totalorder %s3329_s24, 1  ;;  %s3075_s23 = smov 0  }
 0x146   : > { %v2107_v5 = vld [vmem:[%s3330_s6] sm:$0xff]   ;;  %v2108_v6 = vld [vmem:[%s3330_s6 + $0x8] sm:$0xff]  }
 0x147   : > { %s3359_s24 = smov (!%p885_p7, %s3329_s24), 1  ;;  %1901 = vmatpush3.bf16.msra.mxu0 %v2107_v5  ;;  %v2109_v7 = vld [vmem:[%s3331_s1] sm:$0xff]   ;;  %v2110_v8 = vld [vmem:[%s3331_s1 + $0x8] sm:$0xff]  }
 0x148   : > { %1902 = vmatprep.subr.bf16.mxu0 %v2510_v0  ;;  %1909 = vmatpush3.bf16.msra.mxu1 %v2109_v7  ;;  %s1832_s12 = sshll.u32 %s3359_s24, 3  ;;  %v2111_v10 = vld [vmem:[%s3332_s10] sm:$0xff]   ;;  %v2112_v12 = vld [vmem:[%s3332_s10 + $0x8] sm:$0xff]  }
 0x149   : > { %1910 = vmatprep.subr.bf16.mxu1 %v2510_v0  ;;  %s891_s8 = scalar_lea.vmem %s3333_s21, %s1832_s12  ;;  %v1843_v29 = vld [vmem:[%s3334_s27] ss:$0 sm:$0xff] }
 0x14a   : > { %v3049_v13 = vld [vmem:[%s891_s8] sm:$0xff] }
 0x14b   : > { %1903 = vmatpush3.bf16.msra.mxu0 %v2108_v6  ;;  %v1074_v14 = vpack.c.bf16 %v3049_v13, %v3049_v13 }
 0x14c   : > { %1916 = vmatprep.subr.bf16.mxu0 %v2510_v0  ;;  %1911 = vmatpush3.bf16.msra.mxu1 %v2110_v8 }
 0x14e   : > { %1905 = vmatmul.mubr.msk.bf16.vlgmr.msra.gmra.mrb[0].mxu0 %vm921_vm0, %v897_v9 }
 0x14f   : > { %1917 = vmatpush3.bf16.msra.mxu0 %v2111_v10  ;;  %1920 = vmatprep.mubr.msk.bf16.mxu0 %vm2511_vm1, %v2510_v0 }
 0x150   : > { %1913 = vmatmul.mubr.msk.bf16.vlgmr.msra.gmra.mrb[0].mxu1 %vm921_vm0, %v986_v11  ;;  %1918 = vmatprep.subr.bf16.mxu0 %v2510_v0 }
 0x153   : > { %1919 = vmatpush3.bf16.msra.mxu0 %v2112_v12 }
 0x156   : > { %1921 = vmatmul.mubr.msk.bf16.vlgmr.msra.gmra.mrb[4].mxu0 %vm921_vm0, %v1074_v14 }
 0x221   : > { %v959_v16 = vpop.f32.mrb[0].mxu0 }
 0x222   : > { %v960_v18 = vadd.f32 %v1833_v15, %v959_v16  ;;  %v1906_v19 = vpop.f32.mrb[1].mxu0 }
 0x223   : > { %v962_v20 = vpop.f32.mrb[2].mxu0  ;;  %v1047_v21 = vpop.f32.mrb[0].mxu1 }
 0x224   : > { %v965_v22 = vpack.c.bf16 %v960_v18, %v960_v18  ;;  %v1907_v23 = vpop.f32.mrb[3].mxu0  ;;  %v1048_v24 = vadd.f32 %v1838_v17, %v1047_v21  ;;  %v1914_v25 = vpop.f32.mrb[1].mxu1 }
 0x225   : > { %v1050_v26 = vpop.f32.mrb[2].mxu1 }
 0x226   : > { %967 = vst.msk [vmem:[#allocation2] sm:$0xf] %vm966_vm2, %v965_v22  ;;  %v1053_v27 = vpack.c.bf16 %v1048_v24, %v1048_v24  ;;  %981 = vrot.lane.b32.xlu1 %v965_v22, %s2512_s19  ;;  %971 = vrot.lane.b32.xlu0 %v965_v22, %s2513_s29  ;;  %v1915_v28 = vpop.f32.mrb[3].mxu1 }
 0x228   : > { %1054 = vst.msk [vmem:[#allocation3] sm:$0xf] %vm966_vm2, %v1053_v27 }
 0x229   : > { %v1136_v30 = vpop.f32.mrb[4].mxu0 }
 0x22a   : > { %1058 = vrot.lane.b32.xlu1 %v1053_v27, %s2513_s29  ;;  %976 = vrot.lane.b32.xlu0 %v965_v22, %s2514_s7  ;;  %v1137_v31 = vadd.f32 %v1843_v29, %v1136_v30  ;;  %v1922_v32 = vpop.f32.mrb[5].mxu0 }
 0x22b   : > { %v1139_v33 = vpop.f32.mrb[6].mxu0 }
 0x22c   : > { %v1142_v34 = vpack.c.bf16 %v1137_v31, %v1137_v31  ;;  %v1923_v35 = vpop.f32.mrb[7].mxu0 }
 0x22e   : > { %1144 = vst.msk [vmem:[#allocation4] sm:$0xf] %vm966_vm2, %v1142_v34  ;;  %1068 = vrot.lane.b32.xlu1 %v1053_v27, %s2512_s19  ;;  %1063 = vrot.lane.b32.xlu0 %v1053_v27, %s2514_s7 }
 0x232   : > { %1153 = vrot.lane.b32.xlu1 %v1142_v34, %s2514_s7  ;;  %1148 = vrot.lane.b32.xlu0 %v1142_v34, %s2513_s29 }
 0x236   : > { %1158 = vrot.lane.b32.xlu0 %v1142_v34, %s2512_s19 }
 0x298   : > { %v982_v36 = vpop.permute.xlu1 %981  ;;  %v972_v37 = vpop.permute.xlu0 %971 }
 0x299   : > { %985 = vst.msk [vmem:[#allocation2 + $0xc] sm:$0xf] %vm966_vm2, %v982_v36  ;;  %975 = vst.msk [vmem:[#allocation2 + $0x4] sm:$0xf] %vm966_vm2, %v972_v37 }
 0x29c   : > { %v1059_v38 = vpop.permute.xlu1 %1058  ;;  %v977_v39 = vpop.permute.xlu0 %976 }
 0x29d   : > { %1062 = vst.msk [vmem:[#allocation3 + $0x4] sm:$0xf] %vm966_vm2, %v1059_v38  ;;  %980 = vst.msk [vmem:[#allocation2 + $0x8] sm:$0xf] %vm966_vm2, %v977_v39 }
 0x2a0   : > { %v1069_v40 = vpop.permute.xlu1 %1068  ;;  %v1064_v41 = vpop.permute.xlu0 %1063 }
 0x2a1   : > { %1072 = vst.msk [vmem:[#allocation3 + $0xc] sm:$0xf] %vm966_vm2, %v1069_v40  ;;  %1067 = vst.msk [vmem:[#allocation3 + $0x8] sm:$0xf] %vm966_vm2, %v1064_v41 }
 0x2a4   : > { %v1154_v42 = vpop.permute.xlu1 %1153  ;;  %v1149_v43 = vpop.permute.xlu0 %1148 }
 0x2a5   : > { %1157 = vst.msk [vmem:[#allocation4 + $0x8] sm:$0xf] %vm966_vm2, %v1154_v42  ;;  %1152 = vst.msk [vmem:[#allocation4 + $0x4] sm:$0xf] %vm966_vm2, %v1149_v43 }
 0x2a8   : > { %v1159_v44 = vpop.permute.xlu0 %1158 }
 0x2a9   : > { %1162 = vst.msk [vmem:[#allocation4 + $0xc] sm:$0xf] %vm966_vm2, %v1159_v44 }
 0x2aa LB: >> { %v2515_v45 = vmov 0.0   ;;  %vm2516_vm3 = vmmov 0   ;;  %s3082_s3 = sshll.u32 %s2497_s23, 2  ;;  %vm1183_vm4 = vcmask 64512   ;;  %vm1247_vm5 = vcmask 1043456   ;;  %v1291_v16 = vld [vmem:[#allocation5] sm:$0xff]  ;;  %s2497_s23 = sphi %s3075_s23, %s1173_s23  }
 0x2ab   : >> { %1924 = vmatprep.subr.bf16.mxu0 %v2515_v45  ;;  %1926 = vmatprep.mubr.msk.bf16.mxu0 %vm2516_vm3, %v2515_v45  ;;  %s1178_s2 = scalar_lea.vmem [#allocation2], %s3082_s3  ;;  %s1175_s12 = scalar_lea.vmem [#allocation4], %s3082_s3 }
 0x2ac   : >> { %1930 = vmatprep.subr.bf16.mxu1 %v2515_v45  ;;  %1932 = vmatprep.mubr.msk.bf16.mxu1 %vm2516_vm3, %v2515_v45  ;;  %v1179_v46 = vld [vmem:[%s1178_s2] sm:$0xf]  ;;  %s1181_s4 = scalar_lea.vmem [#allocation3], %s3082_s3  ;;  %s1294_s0 = scalar_lea.vmem [#allocation17], %s3082_s3 }
 0x2ad   : >> { %v1188_v47 = vsel %vm1183_vm4, %v1179_v46, 0  ;;  %v1182_v61 = vld [vmem:[%s1181_s4] sm:$0xf]  ;;  %s1173_s23 = sadd.s32 1, %s2497_s23  }
 0x2ae   : >> { %1925 = vmatpush3.bf16.xpose.msra.mxu0 %v1188_v47  ;;  %v1249_v62 = vsel %vm1247_vm5, %v1182_v61, 0  ;;  %v1295_v6 = vld [vmem:[%s1294_s0] sm:$0xf]  ;;  %p1170_p0 = scmp.ge.s32.totalorder %s1173_s23, 4  }
 0x2af   : >> { %1931 = vmatpush3.bf16.msra.mxu1 %v1249_v62  ;;  %v1300_v8 = vsel %vm1247_vm5, %v1295_v6, 0  ;;  %v1855_v23 = vld [vmem:[#allocation18] ss:$0 sm:$0xff] (%p1170_p0)  ;;  %1942 = vmatprep.subr.bf16.mxu0 (%p1170_p0), %v2510_v0  ;;  %s3335_s21 = sld [smem:[#allocation50_spill]] (%p1170_p0)  ;;  %s3336_s29 = sld [smem:[#allocation52_spill]] (%p1170_p0)  ;;  %vm1492_vm6 = vcmask (%p1170_p0), 523264  }
 0x2b0   : >> { %v1176_v48 = vld [vmem:[%s1175_s12] sm:$0xf]  ;;  %1936 = vmatprep.subr.bf16.mxu1 %v2515_v45  ;;  %v1856_v35 = vld [vmem:[#allocation20] ss:$0 sm:$0xff] (%p1170_p0)  ;;  %s3337_s23 = sld [smem:[#allocation49_spill]] (%p1170_p0)  ;;  %s3338_s18 = sld [smem:[#allocation51_spill]] (%p1170_p0) }
 0x2b1   : > { %s3339_s16 = sld [smem:[#allocation53_spill]] (%p1170_p0)  ;;  %s3341_s20 = sld [smem:[#allocation34_spill]] (%p1170_p0) }
 0x2b2   : > { %s3340_s19 = sld [smem:[#allocation30_spill]] (%p1170_p0)  ;;  %s3342_s7 = sld [smem:[#allocation54_spill]] (%p1170_p0) }
 0x2b3   : > { %s3343_s2 = sld [smem:[#allocation55_spill]] (%p1170_p0)  ;;  %s1582_s4 = sshll.u32 (%p1170_p0), %s3073_s17, 4  ;;  %s3160_s4 = int_to_ptr.vmem [resolvable:$true] %s1582_s4 }
 0x2b4   : > { %s1568_s24 = scalar_lea.sflag (%p1170_p0), [#allocation8], %s2966_s30 }
 0x2b5   : >> { %1927 = vmatmul.mubr.msk.bf16.vlgmr.msra.gmra.mrb[0].mxu0 %vm1183_vm4, %v1176_v48  ;;  %v2118_v29 = vld [vmem:[%s3335_s21 + $0x8] sm:$0xff] (%p1170_p0)   ;;  %v2121_v41 = vld [vmem:[%s3336_s29 + $0x10] sm:$0xff] (%p1170_p0)   ;;  %v2122_v42 = vld [vmem:[%s3336_s29 + $0x18] sm:$0xff] (%p1170_p0)  }
 0x2b6   : > { %1946 = vmatprep.mubr.msk.bf16.mxu0 (%p1170_p0), %vm2511_vm1, %v2510_v0  ;;  %v2120_v30 = vld [vmem:[%s3336_s29 + $0x8] sm:$0xff] (%p1170_p0)   ;;  %v1857_v37 = vld [vmem:[%s3337_s23] ss:$0 sm:$0xff] (%p1170_p0) }
 0x2b7   : > { %v1858_v43 = vld [vmem:[%s3338_s18] ss:$0 sm:$0xff] (%p1170_p0)  ;;  %s3344_s18 = sld [smem:[#allocation56_spill]] (%p1170_p0)  ;;  %p3345_p10 = scmp.ne.s32.totalorder (%p1170_p0), %s3341_s20, 0 }
 0x2b8   : > { %s1871_s12 = sshll.u32 (%p1170_p0), %s3340_s19, 7  ;;  %s2517_s19 = smov (%p1170_p0), [#allocation21]  }
 0x2b9   : > { %s2391_s9 = sshll.u32 (%p1170_p0), %s2517_s19, 4  ;;  %s2392_s9 = int_to_ptr.vmem [resolvable:$false] %s2391_s9 }
 0x2ba   : > { %s2393_s27 = scalar_lea.vmem (%p1170_p0), %s2392_s9, 256  ;;  %p2394_p4 = scmp.lt.s32.totalorder (%p1170_p0), %s3160_s4, %s2392_s9 }
 0x2bd   : > { %s3158_s8 = scalar_lea.hbm (%p1170_p0), %s3344_s18, %s1871_s12 }
 0x388   : >> { %v1224_v49 = vpop.f32.mrb[0].mxu0 }
 0x389   : >> { %v1230_v50 = vmul.f32 %v1224_v49, %v1164_v3  ;;  %v1928_v51 = vpop.f32.mrb[1].mxu0 }
 0x38a   : >> { %v1227_v52 = vpop.f32.mrb[2].mxu0 }
 0x38b   : >> { %v1231_v53 = vadd.f32 %v1230_v50, %v1166_v4  ;;  %v1929_v54 = vpop.f32.mrb[3].mxu0  ;;  %v2117_v4 = vld [vmem:[%s3335_s21] sm:$0xff] (%p1170_p0)  }
 0x38c   : > { %1943 = vmatpush3.bf16.msra.mxu0 (%p1170_p0), %v2117_v4 }
 0x38d   : >> { %v1232_v55 = vsel %vm1183_vm4, %v1231_v53, -inf  ;;  %1944 = vmatprep.subr.bf16.mxu0 (%p1170_p0), %v2510_v0 }
 0x38e   : >> { %1233 = vmax.xlane.f32.xlu0 %v1232_v55 }
 0x390   : > { %1945 = vmatpush3.bf16.msra.mxu0 (%p1170_p0), %v2118_v29 }
 0x41b   : >> { %v1234_v56 = vpop.xlane.xlu0 %1233 }
 0x41c   : >> { %v1235_v57 = vsub.f32 %v1231_v53, %v1234_v56 }
 0x41e   : >> { %v1236_v58 = vmul.f32 1.442695, %v1235_v57 }
 0x420   : >> { %2113 = vpow2.f32 %v1236_v58 }
 0x42a   : >> { %v2114_v59 = vpop.eup %2113 }
 0x42b   : >> { %v1238_v60 = vsel %vm1183_vm4, %v2114_v59, 0.0 }
 0x42c   : >> { %1239 = vadd.xlane.f32.xlu0 %v1238_v60 }
 0x4b9   : >> { %v1240_v63 = vpop.xlane.xlu0 %1239 }
 0x4ba   : >> { %2115 = vrcp.f32 %v1240_v63 }
 0x4c4   : >> { %v2116_v5 = vpop.eup %2115 }
 0x4c5   : >> { %v1242_v7 = vmul.f32 %v2116_v5, %v2114_v59 }
 0x4c7   : >> { %v1243_v9 = vpack.c.bf16 %v1242_v7, %v1242_v7 }
 0x4c9   : >> { %1933 = vmatmul.mubr.msk.bf16.vlgmr.msra.gmra.mrb[0].mxu1 %vm1183_vm4, %v1243_v9 }
 0x4ca   : >> { %1937 = vmatpush3.bf16.msra.mxu1 %v1300_v8  ;;  %1938 = vmatprep.mubr.msk.bf16.mxu1 %vm2516_vm3, %v2515_v45  ;;  %v1868_v8 = vld [vmem:[%s3342_s7] ss:$0 sm:$0xff] (%p1170_p0) }
 0x4cb   : > { %1950 = vmatprep.subr.bf16.mxu1 (%p1170_p0), %v2510_v0 }
 0x59c   : >> { %v1285_v10 = vpop.f32.mrb[0].mxu1 }
 0x59d   : >> { %v1292_v11 = vpack.c.bf16 %v1285_v10, %v1285_v10  ;;  %v1934_v12 = vpop.f32.mrb[1].mxu1  ;;  %v1869_v10 = vld [vmem:[%s3343_s2] ss:$0 sm:$0xff] (%p1170_p0) }
 0x59e   : >> { %v1288_v14 = vpop.f32.mrb[2].mxu1 }
 0x59f   : >> { %v1935_v15 = vpop.f32.mrb[3].mxu1  ;;  %1939 = vmatmul.mubr.msk.bf16.vlgmr.msra.gmra.mrb[4].mxu1 %vm1183_vm4, %v1292_v11 }
 0x5a0   : > { %1958 = vmatprep.mubr.msk.bf16.mxu1 (%p1170_p0), %vm2511_vm1, %v2510_v0 }
 0x66f   : > { %1172 = sbr.rel (!%p1170_p0) target bundleno = 682 (0x2aa), region = 233 }
 0x672   : >> { %v1336_v17 = vpop.f32.mrb[4].mxu1 }
 0x673   : >> { %v1342_v18 = vadd.f32 %v1336_v17, %v1291_v16  ;;  %v1940_v19 = vpop.f32.mrb[5].mxu1 }
 0x674   : >> { %v1339_v20 = vpop.f32.mrb[6].mxu1 }
 0x675   : >> { %1343 = vst.msk [vmem:[#allocation5] sm:$0xff] %vm921_vm0, %v1342_v18  ;;  %v1941_v21 = vpop.f32.mrb[7].mxu1 }
 0x67c   : > { %v1344_v22 = vld [vmem:[#allocation5] sm:$0xff] }
 0x67d   : > { %v1352_v24 = vadd.f32 %v1855_v23, %v1344_v22 }
 0x67f   : > { %v1353_v25 = vadd.f32 %v1352_v24, %v3049_v13  ;;  %v2119_v13 = vld [vmem:[%s3336_s29] sm:$0xff]  }
 0x680   : > { %1951 = vmatpush3.bf16.msra.mxu1 %v2119_v13 }
 0x681   : > { %v1354_v26 = vsel %vm921_vm0, %v1353_v25, 0.0  ;;  %1952 = vmatprep.subr.bf16.mxu1 %v2510_v0 }
 0x682   : > { %1355 = vadd.xlane.f32.xlu0 %v1354_v26 }
 0x684   : > { %1953 = vmatpush3.bf16.msra.mxu1 %v2120_v30 }
 0x685   : > { %1954 = vmatprep.subr.bf16.mxu1 %v2510_v0 }
 0x688   : > { %1955 = vmatpush3.bf16.msra.mxu1 %v2121_v41 }
 0x689   : > { %1956 = vmatprep.subr.bf16.mxu1 %v2510_v0  ;;  %v1862_v0 = vld [vmem:[%s3339_s16] ss:$0 sm:$0xff]  ;;  %s2387_s16 = scalar_lea.vmem %s3160_s4, 128 }
 0x68a   : > { %p2388_p11 = scmp.ne.s32.totalorder %s3160_s4, %s2387_s16  ;;  %p2395_p8 = scmp.lt.s32.totalorder %s2393_s27, %s2387_s16 }
 0x68c   : > { %1957 = vmatpush3.bf16.msra.mxu1 %v2122_v42  ;;  %p2389_p3 = pnand %p2388_p11, %p3345_p10  ;;  %p2396_p5 = por %p2395_p8, %p2394_p4 }
 0x68e   : > { %p2390_p12 = pneg %p2389_p3 }
 0x690   : > { %p2397_p13 = pnand %p2396_p5, %p2390_p12 }
 0x70f   : > { %v1356_v27 = vpop.xlane.xlu0 %1355 }
 0x710   : > { %v1358_v28 = vmul.f32 0.03125, %v1356_v27 }
 0x712   : > { %v1359_v1 = vsub.f32 %v1353_v25, %v1358_v28 }
 0x714   : > { %v1360_v2 = vmul.f32 %v1359_v1, %v1359_v1 }
 0x716   : > { %v1361_v3 = vsel %vm921_vm0, %v1360_v2, 0.0 }
 0x717   : > { %1362 = vadd.xlane.f32.xlu0 %v1361_v3 }
 0x7a4   : > { %v1363_v31 = vpop.xlane.xlu0 %1362 }
 0x7a5   : > { %v1364_v32 = vmul.f32 0.03125, %v1363_v31 }
 0x7a7   : > { %v1365_v33 = vadd.f32 1e-05, %v1364_v32 }
 0x7a9   : > { %2123 = vrsqrt.f32 %v1365_v33 }
 0x7b3   : > { %v2124_v34 = vpop.eup %2123 }
 0x7b4   : > { %v1367_v36 = vmul.f32 %v2124_v34, %v1359_v1 }
 0x7b6   : > { %v1375_v38 = vmul.f32 %v1856_v35, %v1367_v36 }
 0x7b8   : > { %v1383_v39 = vadd.f32 %v1857_v37, %v1375_v38 }
 0x7ba   : > { %v1384_v40 = vpack.c.bf16 %v1383_v39, %v1383_v39 }
 0x7bc   : > { %1947 = vmatmul.mubr.msk.bf16.vlgmr.msra.gmra.mrb[0].mxu0 %vm921_vm0, %v1384_v40 }
 0x88f   : > { %v1445_v44 = vpop.f32.mrb[0].mxu0 }
 0x890   : > { %v1446_v45 = vadd.f32 %v1858_v43, %v1445_v44  ;;  %v1948_v46 = vpop.f32.mrb[1].mxu0 }
 0x891   : > { %v1448_v47 = vpop.f32.mrb[2].mxu0 }
 0x892   : > { %v1451_v48 = vmax.f32 %v1446_v45, 0.0  ;;  %v1949_v49 = vpop.f32.mrb[3].mxu0 }
 0x894   : > { %v1452_v50 = vpack.c.bf16 %v1451_v48, %v1451_v48 }
 0x896   : > { %1959 = vmatmul.mubr.msk.bf16.vlgmr.msra.gmra.mrb[0].mxu1 %vm1492_vm6, %v1452_v50 }
 0x969   : > { %v1530_v51 = vpop.f32.mrb[0].mxu1 }
 0x96a   : > { %v1531_v52 = vadd.f32 %v1862_v0, %v1530_v51  ;;  %v1960_v53 = vpop.f32.mrb[1].mxu1 }
 0x96b   : > { %v1533_v54 = vpop.f32.mrb[2].mxu1 }
 0x96c   : > { %v1961_v55 = vpop.f32.mrb[3].mxu1  ;;  %v1536_v56 = vadd.f32 %v1531_v52, %v1383_v39 }
 0x96e   : > { %v1537_v57 = vsel %vm921_vm0, %v1536_v56, 0.0 }
 0x96f   : > { %1538 = vadd.xlane.f32.xlu1 %v1537_v57 }
 0x9fc   : > { %v1539_v58 = vpop.xlane.xlu1 %1538 }
 0x9fd   : > { %v1540_v59 = vmul.f32 0.03125, %v1539_v58 }
 0x9ff   : > { %v1541_v60 = vsub.f32 %v1536_v56, %v1540_v59 }
 0xa01   : > { %v1542_v61 = vmul.f32 %v1541_v60, %v1541_v60 }
 0xa03   : > { %v1543_v62 = vsel %vm921_vm0, %v1542_v61, 0.0 }
 0xa04   : > { %1544 = vadd.xlane.f32.xlu1 %v1543_v62 }
 0xa91   : > { %v1545_v63 = vpop.xlane.xlu1 %1544 }
 0xa92   : > { %v1546_v5 = vmul.f32 0.03125, %v1545_v63 }
 0xa94   : > { %v1547_v6 = vadd.f32 1e-05, %v1546_v5 }
 0xa96   : > { %2125 = vrsqrt.f32 %v1547_v6 }
 0xaa0   : > { %v2126_v7 = vpop.eup %2125 }
 0xaa1   : > { %v1549_v9 = vmul.f32 %v2126_v7, %v1541_v60 }
 0xaa3   : > { %v1557_v11 = vmul.f32 %v1868_v8, %v1549_v9 }
 0xaa5   : > { %v1565_v12 = vadd.f32 %v1869_v10, %v1557_v11 }
 0xaa7   : > { %1566 = vst.msk [vmem:[%s3073_s17] sm:$0xff] %vm921_vm0, %v1565_v12 }
 0xaa8   : > { %2400 = shalt.err (!%p2397_p13)
}
 0xaa9   : > { %s2401_s30 = scalar_lea.hbm %s3158_s8, 128  ;;  %s2405_s23 = scalar_lea.hbm %s3344_s18, 256 }
 0xaaa   : > { %p2402_p1 = scmp.ne.s32.totalorder %s3158_s8, %s2401_s30  ;;  %p2406_p2 = scmp.lt.u32.totalorder %s3158_s8, %s3344_s18 }
 0xaab   : > { %p2407_p7 = scmp.lt.u32.totalorder %s2405_s23, %s2401_s30  ;;  %p2409_p11 = scmp.lt.u32.totalorder %s2401_s30, %s3158_s8 }
 0xaac   : > { %p2403_p9 = pnand %p2402_p1, %p3345_p10 }
 0xaad   : > { %p2408_p0 = por %p2407_p7, %p2406_p2 }
 0xaae   : > { %p2404_p6 = pneg %p2403_p9 }
 0xaaf   : > { %p2410_p3 = por %p2409_p11, %p2408_p0 }
 0xab1   : > { %p2411_p12 = pnand %p2410_p3, %p2404_p6 }
 0xab3   : > { %2414 = shalt.err (!%p2411_p12)
}
 0xab4   : > { %1990 = dma.vmem_to_hbm [thread:$0]  (%p3345_p10), %s3160_s4, 128, %s3158_s8, %s1568_s24  }
 0xab5 PF: > { %s3346_s12 = sld [smem:[#allocation29_spill]]  ;;  %s3347_s0 = sld [smem:[#allocation36_spill]] }
 0xab6   : > { %p3349_p8 = scmp.ge.s32.totalorder %s2493_s28, 2 }
 0xabb   : > { %s1594_s5 = sand.u32 1, %s3346_s12   ;;  %p3348_p4 = scmp.ne.s32.totalorder %s3347_s0, 0 }
 0xabc   : > { %s1595_s16 = scalar_lea.sflag [#allocation8], %s1594_s5 }
 0xabd   : > { %p2022_p5 = pnand %p3349_p8, %p3348_p4 }
 0xabf   : > { %2468 = dma.done.wait (!%p2022_p5), %s1595_s16, 128  }
 0xac0   : > { %2470 = vsyncadd (!%p2022_p5), %s1595_s16, 4294967168  ;;  %s45_s28 = sadd.s32 1, %s2493_s28   ;;  %s3350_s20 = sld [smem:[#allocation35_spill]] }
 0xac1   : > { %p42_p13 = scmp.ge.s32.totalorder %s45_s28, 4   ;;  %s3351_s27 = sld [smem:[#allocation31_spill]] }
 0xac2   : > { %s3352_s3 = sld [smem:[#allocation33_spill]]  ;;  %s3353_s2 = smov %s2477_s25 }
 0xac3   : > { %s3354_s25 = smov %s2481_s26  ;;  %44 = sbr.rel (!%p42_p13) target bundleno = 33 (0x21), region = 244 }
 0xac6   : > { %s3355_s26 = smov %s3350_s20 }
 0xaca   :  { %1600 = vsyncpa [#allocation7], 1 }
 0xacb   :  { %1602 = vsyncpa [#allocation7 + $0x1], 1 }
 0xacc   :  { %1603 = vsyncpa [#allocation10], 1 }
 0xacd   :  { %1605 = vsyncpa [#allocation10 + $0x1], 1 }
 0xace   :  { %1606 = vsyncpa [#allocation13], 1 }
 0xacf   :  { %1608 = vsyncpa [#allocation13 + $0x1], 1 }
 0xad0   :  { %1609 = vsyncpa [#allocation16], 1 }
 0xad1   :  { %1610 = vsyncpa [#allocation19], 1 }
 0xad2   :  { %1611 = vsyncpa [#allocation8], 1 }
 0xad3   :  { %1613 = vsyncpa [#allocation8 + $0x1], 1 }

</bundles_post_ra>
